<compile_context>
chip_gen: v6e
topology: v6e:2x2x1
jax: 0.10.0
libtpu: 0.0.40
codegen_flags: <defaults>
</compile_context>

<pallas_src>
import jax
import jax.numpy as jnp
from jax.experimental import pallas as pl
from jax.experimental.pallas import tpu as pltpu


# ---- static geometry (asserted so a kernel/stride/pool change fails loudly) --
IMG = 28                               # input spatial size (pinned by fc1)
C1K, C1S = 4, 1                        # conv1 kernel / stride
C1O = (IMG - C1K) // C1S + 1           # 25
C2K, C2S = 4, 2                        # conv2 kernel / stride
C2O = (C1O - C2K) // C2S + 1           # 11
PK, PS = 2, 2                          # max-pool kernel / stride
PO = (C2O - PK) // PS + 1              # 5
CH = 20                                # conv channels
FEAT = CH * PO * PO                    # 500
HID_RAW, HID = 250, 256                # fc1 width, zero-padded to 2 full vregs
NCLS = 10
assert (C1O, C2O, PO, FEAT) == (25, 11, 5, 500), "CNN_2 geometry changed"

_SHIFT_PAD = 128                       # >= max conv1 tap offset 3*28+3 = 87
_CONV1_OFFS = tuple(dy * IMG + dx for dy in range(C1K) for dx in range(C1K))


# ---------------------------------------------------------------------------
# Pallas kernels
# ---------------------------------------------------------------------------

def _conv1_kernel(x_ref, w_ref, b_ref, o_ref):
    """conv1 + ReLU with the im2col fused in-kernel.

    x_ref: (1, 1, L + _SHIFT_PAD) f32  -- bt flattened 28x28 images (+ slack),
    w_ref: (20, 16) bf16, b_ref: (20, 1) f32,
    o_ref: (1, 20, L) bf16             -- channel-major, flat spatial kept on
           the 28-wide grid (rows/cols >= 25 hold don't-care values).
    """
    L = o_ref.shape[-1]
    x = x_ref[0]                                             # (1, L + pad) f32
    # 16 lane-shifted views of the flat image == the im2col patch matrix.
    # Static slices of a VMEM-resident value; never round-trips through HBM.
    p = jnp.concatenate([x[:, off:off + L] for off in _CONV1_OFFS], axis=0)
    z = jnp.dot(w_ref[...], p.astype(w_ref.dtype),
                preferred_element_type=jnp.float32)          # (20, L)
    o_ref[0] = jnp.maximum(z + b_ref[...], 0.0).astype(o_ref.dtype)


def _conv2_pool_kernel(p_ref, w_ref, b_ref, o_ref):
    """conv2 + ReLU + 2x2/2 max-pool fused, as ONE wide MXU matmul.

    p_ref: (1, 320, 4*N) bf16 -- the 4 pool phases concatenated on the lane
           axis (phase-major blocks of N columns), N = bt*25.
    w_ref: (20, 320) bf16, b_ref: (20, 1) f32, o_ref: (1, 20, N) bf16.
    relu(max_k z_k + b) == max_k relu(z_k + b) because b is per-channel.
    """
    N = o_ref.shape[-1]
    z = jnp.dot(w_ref[...], p_ref[0], preferred_element_type=jnp.float32)
    m = jnp.maximum(jnp.maximum(z[:, 0:N], z[:, N:2 * N]),
                    jnp.maximum(z[:, 2 * N:3 * N], z[:, 3 * N:4 * N]))
    o_ref[0] = jnp.maximum(m + b_ref[...], 0.0).astype(o_ref.dtype)


def _fc_kernel(x_ref, w1_ref, b1_ref, w2_ref, b2_ref, o_ref):
    """Fused fc1 + ReLU + fc2 (hidden zero-padded 250 -> 256)."""
    h = jnp.dot(x_ref[...], w1_ref[...], preferred_element_type=jnp.float32)
    h = jnp.maximum(h + b1_ref[...], 0.0).astype(w2_ref.dtype)
    out = jnp.dot(h, w2_ref[...], preferred_element_type=jnp.float32)
    o_ref[...] = (out + b2_ref[...]).astype(o_ref.dtype)


# ---------------------------------------------------------------------------
# pallas_call wrappers
# ---------------------------------------------------------------------------

def conv1_fused(x_flat, w, b):
    """x_flat: (G, 1, L+pad) f32 -> (G, 20, L) bf16, L = bt*784."""
    G, _, Lp = x_flat.shape
    L = Lp - _SHIFT_PAD
    return pl.pallas_call(
        _conv1_kernel,
        out_shape=jax.ShapeDtypeStruct((G, CH, L), jnp.bfloat16),
        grid=(G,),
        in_specs=[
            pl.BlockSpec((1, 1, Lp), lambda g: (g, 0, 0)),
            pl.BlockSpec((CH, C1K * C1K), lambda g: (0, 0)),
            pl.BlockSpec((CH, 1), lambda g: (0, 0)),
        ],
        out_specs=pl.BlockSpec((1, CH, L), lambda g: (g, 0, 0)),
        compiler_params=pltpu.CompilerParams(
            dimension_semantics=("parallel",)),
    )(x_flat, w, b)


def conv2_pool_fused(p2, w, b):
    """p2: (G, 320, 4*N) bf16 -> (G, 20, N) bf16, N = bt*25."""
    G, K, N4 = p2.shape
    N = N4 // 4
    return pl.pallas_call(
        _conv2_pool_kernel,
        out_shape=jax.ShapeDtypeStruct((G, CH, N), jnp.bfloat16),
        grid=(G,),
        in_specs=[
            pl.BlockSpec((1, K, N4), lambda g: (g, 0, 0)),
            pl.BlockSpec((CH, K), lambda g: (0, 0)),
            pl.BlockSpec((CH, 1), lambda g: (0, 0)),
        ],
        out_specs=pl.BlockSpec((1, CH, N), lambda g: (g, 0, 0)),
        compiler_params=pltpu.CompilerParams(
            dimension_semantics=("parallel",)),
    )(p2, w, b)


def fused_fc(x, w1, b1, w2, b2):
    """x: (B, 500) bf16 -> (B, 10) f32.  The batch is grid-split into two
    'parallel' steps only when large enough to feed both v7x TensorCores."""
    B, F = x.shape
    H = w1.shape[1]
    N = w2.shape[1]
    bm = B // 2 if (B >= 256 and B % 2 == 0) else B
    return pl.pallas_call(
        _fc_kernel,
        out_shape=jax.ShapeDtypeStruct((B, N), jnp.float32),
        grid=(B // bm,),
        in_specs=[
            pl.BlockSpec((bm, F), lambda i: (i, 0)),
            pl.BlockSpec((F, H), lambda i: (0, 0)),
            pl.BlockSpec((1, H), lambda i: (0, 0)),
            pl.BlockSpec((H, N), lambda i: (0, 0)),
            pl.BlockSpec((1, N), lambda i: (0, 0)),
        ],
        out_specs=pl.BlockSpec((bm, N), lambda i: (i, 0)),
        compiler_params=pltpu.CompilerParams(
            dimension_semantics=("parallel",)),
    )(x, w1, b1, w2, b2)


# ---------------------------------------------------------------------------
# Parameters (PyTorch CNN_2 shapes) and kernel-ready layouts
# ---------------------------------------------------------------------------

def init_params(key):
    """Deterministic synthetic parameters matching CNN_2.__init__ shapes."""
    ks = jax.random.split(key, 8)
    s = 0.1
    return {
        "conv1_w": jax.random.normal(ks[0], (CH, 1, C1K, C1K), jnp.float32) * s,
        "conv1_b": jax.random.normal(ks[1], (CH,), jnp.float32) * s,
        "conv2_w": jax.random.normal(ks[2], (CH, CH, C2K, C2K), jnp.float32) * s,
        "conv2_b": jax.random.normal(ks[3], (CH,), jnp.float32) * s,
        "fc1_w": jax.random.normal(ks[4], (HID_RAW, FEAT), jnp.float32) * s,
        "fc1_b": jax.random.normal(ks[5], (HID_RAW,), jnp.float32) * s,
        "fc2_w": jax.random.normal(ks[6], (NCLS, HID_RAW), jnp.float32) * s,
        "fc2_b": jax.random.normal(ks[7], (NCLS,), jnp.float32) * s,
    }


def prepare_params(p):
    """One-time (outside jit) conversion to kernel-ready layouts / dtypes.

    fc1's output dim is zero-padded 250 -> 256 (fc1_b padded with 0, fc2_w
    padded with zero rows): mathematically identical (relu(0)=0, zero rows
    contribute nothing) and makes the hidden activation two full vregs.
    bf16 weights (f32 accumulate) give ~1e-2 relative error vs. an f32
    PyTorch reference -- fine for inference.
    """
    pad_h = HID - HID_RAW
    return {
        # conv1: (20, 1, 4, 4) -> (20, 16); column order (dy, dx).
        "conv1_w": p["conv1_w"].reshape(CH, C1K * C1K).astype(jnp.bfloat16),
        "conv1_b": p["conv1_b"].reshape(CH, 1).astype(jnp.float32),
        # conv2: (co, ci, ky, kx) -> (co, ky, kx, ci) -> (20, 320); (dy, dx, ci).
        "conv2_w": p["conv2_w"].transpose(0, 2, 3, 1)
                               .reshape(CH, CH * C2K * C2K).astype(jnp.bfloat16),
        "conv2_b": p["conv2_b"].reshape(CH, 1).astype(jnp.float32),
        # nn.Linear computes x @ W.T + b: store W pre-transposed (and padded).
        "fc1_w": jnp.pad(p["fc1_w"].T, ((0, 0), (0, pad_h))).astype(jnp.bfloat16),
        "fc1_b": jnp.pad(p["fc1_b"], (0, pad_h)).reshape(1, HID).astype(jnp.float32),
        "fc2_w": jnp.pad(p["fc2_w"].T, ((0, pad_h), (0, 0))).astype(jnp.bfloat16),
        "fc2_b": p["fc2_b"].reshape(1, NCLS).astype(jnp.float32),
    }


# ---------------------------------------------------------------------------
# Forward pass (only thin layout glue stays in plain JAX)
# ---------------------------------------------------------------------------

def _pick_batch_tile(B):
    """Samples packed on the lane axis per grid step: largest divisor of B
    up to 64.  v5e/v6e have one TensorCore, so fewer/fatter steps win (per-step
    overhead ~0.35us -> grid=1 for small B); the 64 cap keeps the per-step
    VMEM footprint (conv2 patches ~64KB*bt, double-buffered) far inside v7x's
    64 MiB VMEM and automatically yields >=2 'parallel' steps once B >= 128."""
    best = 1
    for bt in range(1, min(B, 64) + 1):
        if B % bt == 0:
            best = bt
    return best


def cnn2_forward(kp, x_nchw):
    assert x_nchw.shape[1:] == (1, IMG, IMG), "CNN_2 geometry is pinned by fc1"
    B = x_nchw.shape[0]
    bt = _pick_batch_tile(B)
    G = B // bt
    L = bt * IMG * IMG

    # ---- conv1 + ReLU (im2col fused in-kernel) ------------------------------
    x = x_nchw.reshape(G, 1, L).astype(jnp.float32)
    x = jnp.pad(x, ((0, 0), (0, 0), (0, _SHIFT_PAD)))   # slack for in-kernel shifts
    y1 = conv1_fused(x, kp["conv1_w"], kp["conv1_b"])   # (G, 20, bt*784) bf16
    # Valid conv1 outputs live at rows/cols < 25 of each 28x28 plane; the rest
    # are don't-care values that are never read below.
    y1 = y1.reshape(G, CH, bt, IMG, IMG)

    # ---- conv2 + ReLU + MaxPool2d(2,2): 4 pool-phase patch matrices ---------
    # pooled[u,v] under phase (pu,pv), tap (dy,dx) reads y1 row 4u + 2pu + dy,
    # i.e. rows [2pu, 2pu+20) split as (u major, dy minor); same for columns.
    phases = []
    for pu in range(PK):
        for pv in range(PK):
            blk = y1[:, :, :,
                     2 * pu:2 * pu + PO * C2K,
                     2 * pv:2 * pv + PO * C2K]                 # (G,ci,b,20,20)
            blk = blk.reshape(G, CH, bt, PO, C2K, PO, C2K)     # (G,ci,b,u,dy,v,dx)
            blk = blk.transpose(0, 4, 6, 1, 2, 3, 5)           # (G,dy,dx,ci,b,u,v)
            phases.append(blk.reshape(G, CH * C2K * C2K, bt * PO * PO))
    p2 = jnp.concatenate(phases, axis=-1)          # (G, 320, 4*bt*25)
    pooled = conv2_pool_fused(p2, kp["conv2_w"], kp["conv2_b"])  # (G, 20, bt*25)

    # ---- flatten to PyTorch view(B, -1) order: (c, h, w) per sample ---------
    # TODO(synk): for bt > 1 this is a small genuine relayout between the conv
    # and fc kernels; folding it into the conv2 epilogue would need an
    # in-kernel minor-dim transpose, deliberately avoided for lowering safety.
    flat = (pooled.reshape(G, CH, bt, PO * PO)
                  .transpose(0, 2, 1, 3)
                  .reshape(B, FEAT))                            # (B, 500) bf16

    # TODO(synk): Dropout(p=0.5) is identity (inference/eval mode); a
    # training-mode mask would use pltpu.prng_seed / pltpu.prng_random_bits.

    # ---- fc1 + ReLU + fc2 (single fused kernel, hidden padded to 256) -------
    return fused_fc(flat, kp["fc1_w"], kp["fc1_b"], kp["fc2_w"], kp["fc2_b"])


if __name__ == "__main__":
    key = jax.random.PRNGKey(0)
    k_params, k_x = jax.random.split(key)
    params = init_params(k_params)
    kparams = prepare_params(params)

    # fc1 expects 20*5*5 features, which pins the input to 1x28x28 (MNIST-like).
    x = jax.random.normal(k_x, (2, 1, IMG, IMG), jnp.float32)

    out = jax.jit(cnn2_forward)(kparams, x)
    out = jax.block_until_ready(out)
    assert out.shape == (2, NCLS) and out.dtype == jnp.float32
    print("KERNEL_OK")
</pallas_src>

<mosaic_0001>
module attributes {stable_mosaic.version = 11 : i64} {
  func.func @_conv1_kernel(%arg0: i32, %arg1: memref<1x1x1696xf32, #tpu.memory_space<vmem>>, %arg2: memref<20x16xbf16, #tpu.memory_space<vmem>>, %arg3: memref<20x1xf32, #tpu.memory_space<vmem>>, %arg4: memref<1x20x1568xbf16, #tpu.memory_space<vmem>>) attributes {dimension_semantics = [#tpu.dimension_semantics<parallel>], iteration_bounds = array<i64: 1>, scalar_prefetch = 0 : i64, scratch_operands = 0 : i64, tpu.core_type = #tpu.core_type<tc>, window_params = [{transform_indices = @transform_0, window_bounds = array<i64: 1, 1, 1696>}, {pipeline_mode = #tpu.pipeline_mode<synchronous>, transform_indices = @transform_1, window_bounds = array<i64: 20, 16>}, {pipeline_mode = #tpu.pipeline_mode<synchronous>, transform_indices = @transform_2, window_bounds = array<i64: 20, 1>}, {transform_indices = @transform_3, window_bounds = array<i64: 1, 20, 1568>}]} {
    %c0 = arith.constant 0 : index
    %c0_0 = arith.constant 0 : index
    %c0_1 = arith.constant 0 : index
    %0 = vector.load %arg1[%c0, %c0_0, %c0_1] : memref<1x1x1696xf32, #tpu.memory_space<vmem>>, vector<1x1x1696xf32>
    %1 = vector.shape_cast %0 : vector<1x1x1696xf32> to vector<1x1696xf32>
    %2 = vector.extract_strided_slice %1 {offsets = [0, 0], sizes = [1, 1568], strides = [1, 1]} : vector<1x1696xf32> to vector<1x1568xf32>
    %3 = vector.extract_strided_slice %1 {offsets = [0, 1], sizes = [1, 1568], strides = [1, 1]} : vector<1x1696xf32> to vector<1x1568xf32>
    %4 = vector.extract_strided_slice %1 {offsets = [0, 2], sizes = [1, 1568], strides = [1, 1]} : vector<1x1696xf32> to vector<1x1568xf32>
    %5 = vector.extract_strided_slice %1 {offsets = [0, 3], sizes = [1, 1568], strides = [1, 1]} : vector<1x1696xf32> to vector<1x1568xf32>
    %6 = vector.extract_strided_slice %1 {offsets = [0, 28], sizes = [1, 1568], strides = [1, 1]} : vector<1x1696xf32> to vector<1x1568xf32>
    %7 = vector.extract_strided_slice %1 {offsets = [0, 29], sizes = [1, 1568], strides = [1, 1]} : vector<1x1696xf32> to vector<1x1568xf32>
    %8 = vector.extract_strided_slice %1 {offsets = [0, 30], sizes = [1, 1568], strides = [1, 1]} : vector<1x1696xf32> to vector<1x1568xf32>
    %9 = vector.extract_strided_slice %1 {offsets = [0, 31], sizes = [1, 1568], strides = [1, 1]} : vector<1x1696xf32> to vector<1x1568xf32>
    %10 = vector.extract_strided_slice %1 {offsets = [0, 56], sizes = [1, 1568], strides = [1, 1]} : vector<1x1696xf32> to vector<1x1568xf32>
    %11 = vector.extract_strided_slice %1 {offsets = [0, 57], sizes = [1, 1568], strides = [1, 1]} : vector<1x1696xf32> to vector<1x1568xf32>
    %12 = vector.extract_strided_slice %1 {offsets = [0, 58], sizes = [1, 1568], strides = [1, 1]} : vector<1x1696xf32> to vector<1x1568xf32>
    %13 = vector.extract_strided_slice %1 {offsets = [0, 59], sizes = [1, 1568], strides = [1, 1]} : vector<1x1696xf32> to vector<1x1568xf32>
    %14 = vector.extract_strided_slice %1 {offsets = [0, 84], sizes = [1, 1568], strides = [1, 1]} : vector<1x1696xf32> to vector<1x1568xf32>
    %15 = vector.extract_strided_slice %1 {offsets = [0, 85], sizes = [1, 1568], strides = [1, 1]} : vector<1x1696xf32> to vector<1x1568xf32>
    %16 = vector.extract_strided_slice %1 {offsets = [0, 86], sizes = [1, 1568], strides = [1, 1]} : vector<1x1696xf32> to vector<1x1568xf32>
    %17 = vector.extract_strided_slice %1 {offsets = [0, 87], sizes = [1, 1568], strides = [1, 1]} : vector<1x1696xf32> to vector<1x1568xf32>
    %18 = tpu.concatenate %2, %3, %4, %5, %6, %7, %8, %9, %10, %11, %12, %13, %14, %15, %16, %17 in 0 : vector<1x1568xf32>, vector<1x1568xf32>, vector<1x1568xf32>, vector<1x1568xf32>, vector<1x1568xf32>, vector<1x1568xf32>, vector<1x1568xf32>, vector<1x1568xf32>, vector<1x1568xf32>, vector<1x1568xf32>, vector<1x1568xf32>, vector<1x1568xf32>, vector<1x1568xf32>, vector<1x1568xf32>, vector<1x1568xf32>, vector<1x1568xf32> -> vector<16x1568xf32>
    %c0_2 = arith.constant 0 : index
    %c0_3 = arith.constant 0 : index
    %19 = vector.load %arg2[%c0_2, %c0_3] : memref<20x16xbf16, #tpu.memory_space<vmem>>, vector<20x16xbf16>
    %20 = arith.truncf %18 : vector<16x1568xf32> to vector<16x1568xbf16>
    %cst = arith.constant dense<0.000000e+00> : vector<20x1568xf32>
    %21 = tpu.matmul %19, %20, %cst {dimension_numbers = #tpu.dot_dimension_numbers<[1], [0], [0], [1], [0, 0, 1, 1], [], []>} : vector<20x16xbf16>, vector<16x1568xbf16>, vector<20x1568xf32> -> vector<20x1568xf32>
    %c0_4 = arith.constant 0 : index
    %c0_5 = arith.constant 0 : index
    %22 = vector.load %arg3[%c0_4, %c0_5] : memref<20x1xf32, #tpu.memory_space<vmem>>, vector<20x1xf32>
    %23 = vector.broadcast %22 : vector<20x1xf32> to vector<20x1568xf32>
    %24 = arith.addf %21, %23 : vector<20x1568xf32>
    %cst_6 = arith.constant 0.000000e+00 : f32
    %25 = vector.broadcast %cst_6 : f32 to vector<20x1568xf32>
    %26 = arith.maximumf %24, %25 : vector<20x1568xf32>
    %27 = arith.truncf %26 : vector<20x1568xf32> to vector<20x1568xbf16>
    %c0_7 = arith.constant 0 : index
    %c0_8 = arith.constant 0 : index
    %c0_9 = arith.constant 0 : index
    %28 = vector.load %arg4[%c0_7, %c0_8, %c0_9] : memref<1x20x1568xbf16, #tpu.memory_space<vmem>>, vector<1x20x1568xbf16>
    %29 = vector.shape_cast %28 : vector<1x20x1568xbf16> to vector<20x1568xbf16>
    %30 = vector.shape_cast %27 : vector<20x1568xbf16> to vector<1x20x1568xbf16>
    tpu.vector_store %arg4[%c0_7, %c0_8, %c0_9], %30 {strides = array<i32>} : memref<1x20x1568xbf16, #tpu.memory_space<vmem>>, vector<1x20x1568xbf16>,
    return
  }
  func.func @transform_0(%arg0: i32) -> (i32, i32, i32) {
    %c0_i32 = arith.constant 0 : i32
    %c0_i32_0 = arith.constant 0 : i32
    %c0_i32_1 = arith.constant 0 : i32
    return %arg0, %c0_i32, %c0_i32_0 : i32, i32, i32
  }
  func.func @transform_1(%arg0: i32) -> (i32, i32) {
    %c0_i32 = arith.constant 0 : i32
    %c0_i32_0 = arith.constant 0 : i32
    %c0_i32_1 = arith.constant 0 : i32
    return %c0_i32, %c0_i32_0 : i32, i32
  }
  func.func @transform_2(%arg0: i32) -> (i32, i32) {
    %c0_i32 = arith.constant 0 : i32
    %c0_i32_0 = arith.constant 0 : i32
    %c0_i32_1 = arith.constant 0 : i32
    return %c0_i32, %c0_i32_0 : i32, i32
  }
  func.func @transform_3(%arg0: i32) -> (i32, i32, i32) {
    %c0_i32 = arith.constant 0 : i32
    %c0_i32_0 = arith.constant 0 : i32
    %c0_i32_1 = arith.constant 0 : i32
    return %arg0, %c0_i32, %c0_i32_0 : i32, i32, i32
  }
}

module attributes {stable_mosaic.version = 11 : i64} {
  func.func @_conv2_pool_kernel(%arg0: i32, %arg1: memref<1x320x200xbf16, #tpu.memory_space<vmem>>, %arg2: memref<20x320xbf16, #tpu.memory_space<vmem>>, %arg3: memref<20x1xf32, #tpu.memory_space<vmem>>, %arg4: memref<1x20x50xbf16, #tpu.memory_space<vmem>>) attributes {dimension_semantics = [#tpu.dimension_semantics<parallel>], iteration_bounds = array<i64: 1>, scalar_prefetch = 0 : i64, scratch_operands = 0 : i64, tpu.core_type = #tpu.core_type<tc>, window_params = [{transform_indices = @transform_0, window_bounds = array<i64: 1, 320, 200>}, {pipeline_mode = #tpu.pipeline_mode<synchronous>, transform_indices = @transform_1, window_bounds = array<i64: 20, 320>}, {pipeline_mode = #tpu.pipeline_mode<synchronous>, transform_indices = @transform_2, window_bounds = array<i64: 20, 1>}, {transform_indices = @transform_3, window_bounds = array<i64: 1, 20, 50>}]} {
    %c0 = arith.constant 0 : index
    %c0_0 = arith.constant 0 : index
    %0 = vector.load %arg2[%c0, %c0_0] : memref<20x320xbf16, #tpu.memory_space<vmem>>, vector<20x320xbf16>
    %c0_1 = arith.constant 0 : index
    %c0_2 = arith.constant 0 : index
    %c0_3 = arith.constant 0 : index
    %1 = vector.load %arg1[%c0_1, %c0_2, %c0_3] : memref<1x320x200xbf16, #tpu.memory_space<vmem>>, vector<1x320x200xbf16>
    %2 = vector.shape_cast %1 : vector<1x320x200xbf16> to vector<320x200xbf16>
    %cst = arith.constant dense<0.000000e+00> : vector<20x200xf32>
    %3 = tpu.matmul %0, %2, %cst {dimension_numbers = #tpu.dot_dimension_numbers<[1], [0], [0], [1], [0, 0, 1, 1], [], []>} : vector<20x320xbf16>, vector<320x200xbf16>, vector<20x200xf32> -> vector<20x200xf32>
    %4 = vector.extract_strided_slice %3 {offsets = [0, 0], sizes = [20, 50], strides = [1, 1]} : vector<20x200xf32> to vector<20x50xf32>
    %5 = vector.extract_strided_slice %3 {offsets = [0, 50], sizes = [20, 50], strides = [1, 1]} : vector<20x200xf32> to vector<20x50xf32>
    %6 = arith.maximumf %4, %5 : vector<20x50xf32>
    %7 = vector.extract_strided_slice %3 {offsets = [0, 100], sizes = [20, 50], strides = [1, 1]} : vector<20x200xf32> to vector<20x50xf32>
    %8 = vector.extract_strided_slice %3 {offsets = [0, 150], sizes = [20, 50], strides = [1, 1]} : vector<20x200xf32> to vector<20x50xf32>
    %9 = arith.maximumf %7, %8 : vector<20x50xf32>
    %10 = arith.maximumf %6, %9 : vector<20x50xf32>
    %c0_4 = arith.constant 0 : index
    %c0_5 = arith.constant 0 : index
    %11 = vector.load %arg3[%c0_4, %c0_5] : memref<20x1xf32, #tpu.memory_space<vmem>>, vector<20x1xf32>
    %12 = vector.broadcast %11 : vector<20x1xf32> to vector<20x50xf32>
    %13 = arith.addf %10, %12 : vector<20x50xf32>
    %cst_6 = arith.constant 0.000000e+00 : f32
    %14 = vector.broadcast %cst_6 : f32 to vector<20x50xf32>
    %15 = arith.maximumf %13, %14 : vector<20x50xf32>
    %16 = arith.truncf %15 : vector<20x50xf32> to vector<20x50xbf16>
    %c0_7 = arith.constant 0 : index
    %c0_8 = arith.constant 0 : index
    %c0_9 = arith.constant 0 : index
    %17 = vector.load %arg4[%c0_7, %c0_8, %c0_9] : memref<1x20x50xbf16, #tpu.memory_space<vmem>>, vector<1x20x50xbf16>
    %18 = vector.shape_cast %17 : vector<1x20x50xbf16> to vector<20x50xbf16>
    %19 = vector.shape_cast %16 : vector<20x50xbf16> to vector<1x20x50xbf16>
    tpu.vector_store %arg4[%c0_7, %c0_8, %c0_9], %19 {strides = array<i32>} : memref<1x20x50xbf16, #tpu.memory_space<vmem>>, vector<1x20x50xbf16>,
    return
  }
  func.func @transform_0(%arg0: i32) -> (i32, i32, i32) {
    %c0_i32 = arith.constant 0 : i32
    %c0_i32_0 = arith.constant 0 : i32
    %c0_i32_1 = arith.constant 0 : i32
    return %arg0, %c0_i32, %c0_i32_0 : i32, i32, i32
  }
  func.func @transform_1(%arg0: i32) -> (i32, i32) {
    %c0_i32 = arith.constant 0 : i32
    %c0_i32_0 = arith.constant 0 : i32
    %c0_i32_1 = arith.constant 0 : i32
    return %c0_i32, %c0_i32_0 : i32, i32
  }
  func.func @transform_2(%arg0: i32) -> (i32, i32) {
    %c0_i32 = arith.constant 0 : i32
    %c0_i32_0 = arith.constant 0 : i32
    %c0_i32_1 = arith.constant 0 : i32
    return %c0_i32, %c0_i32_0 : i32, i32
  }
  func.func @transform_3(%arg0: i32) -> (i32, i32, i32) {
    %c0_i32 = arith.constant 0 : i32
    %c0_i32_0 = arith.constant 0 : i32
    %c0_i32_1 = arith.constant 0 : i32
    return %arg0, %c0_i32, %c0_i32_0 : i32, i32, i32
  }
}

module attributes {stable_mosaic.version = 11 : i64} {
  func.func @_fc_kernel(%arg0: i32, %arg1: memref<2x500xbf16, #tpu.memory_space<vmem>>, %arg2: memref<500x256xbf16, #tpu.memory_space<vmem>>, %arg3: memref<1x256xf32, #tpu.memory_space<vmem>>, %arg4: memref<256x10xbf16, #tpu.memory_space<vmem>>, %arg5: memref<1x10xf32, #tpu.memory_space<vmem>>, %arg6: memref<2x10xf32, #tpu.memory_space<vmem>>) attributes {dimension_semantics = [#tpu.dimension_semantics<parallel>], iteration_bounds = array<i64: 1>, scalar_prefetch = 0 : i64, scratch_operands = 0 : i64, tpu.core_type = #tpu.core_type<tc>, window_params = [{transform_indices = @transform_0, window_bounds = array<i64: 2, 500>}, {pipeline_mode = #tpu.pipeline_mode<synchronous>, transform_indices = @transform_1, window_bounds = array<i64: 500, 256>}, {pipeline_mode = #tpu.pipeline_mode<synchronous>, transform_indices = @transform_2, window_bounds = array<i64: 1, 256>}, {pipeline_mode = #tpu.pipeline_mode<synchronous>, transform_indices = @transform_3, window_bounds = array<i64: 256, 10>}, {pipeline_mode = #tpu.pipeline_mode<synchronous>, transform_indices = @transform_4, window_bounds = array<i64: 1, 10>}, {transform_indices = @transform_5, window_bounds = array<i64: 2, 10>}]} {
    %c0 = arith.constant 0 : index
    %c0_0 = arith.constant 0 : index
    %0 = vector.load %arg1[%c0, %c0_0] : memref<2x500xbf16, #tpu.memory_space<vmem>>, vector<2x500xbf16>
    %c0_1 = arith.constant 0 : index
    %c0_2 = arith.constant 0 : index
    %1 = vector.load %arg2[%c0_1, %c0_2] : memref<500x256xbf16, #tpu.memory_space<vmem>>, vector<500x256xbf16>
    %cst = arith.constant dense<0.000000e+00> : vector<2x256xf32>
    %2 = tpu.matmul %0, %1, %cst {dimension_numbers = #tpu.dot_dimension_numbers<[1], [0], [0], [1], [0, 0, 1, 1], [], []>} : vector<2x500xbf16>, vector<500x256xbf16>, vector<2x256xf32> -> vector<2x256xf32>
    %c0_3 = arith.constant 0 : index
    %c0_4 = arith.constant 0 : index
    %3 = vector.load %arg3[%c0_3, %c0_4] : memref<1x256xf32, #tpu.memory_space<vmem>>, vector<1x256xf32>
    %4 = vector.broadcast %3 : vector<1x256xf32> to vector<2x256xf32>
    %5 = arith.addf %2, %4 : vector<2x256xf32>
    %cst_5 = arith.constant 0.000000e+00 : f32
    %6 = vector.broadcast %cst_5 : f32 to vector<2x256xf32>
    %7 = arith.maximumf %5, %6 : vector<2x256xf32>
    %8 = arith.truncf %7 : vector<2x256xf32> to vector<2x256xbf16>
    %c0_6 = arith.constant 0 : index
    %c0_7 = arith.constant 0 : index
    %9 = vector.load %arg4[%c0_6, %c0_7] : memref<256x10xbf16, #tpu.memory_space<vmem>>, vector<256x10xbf16>
    %cst_8 = arith.constant dense<0.000000e+00> : vector<2x10xf32>
    %10 = tpu.matmul %8, %9, %cst_8 {dimension_numbers = #tpu.dot_dimension_numbers<[1], [0], [0], [1], [0, 0, 1, 1], [], []>} : vector<2x256xbf16>, vector<256x10xbf16>, vector<2x10xf32> -> vector<2x10xf32>
    %c0_9 = arith.constant 0 : index
    %c0_10 = arith.constant 0 : index
    %11 = vector.load %arg5[%c0_9, %c0_10] : memref<1x10xf32, #tpu.memory_space<vmem>>, vector<1x10xf32>
    %12 = vector.broadcast %11 : vector<1x10xf32> to vector<2x10xf32>
    %13 = arith.addf %10, %12 : vector<2x10xf32>
    %c0_11 = arith.constant 0 : index
    %c0_12 = arith.constant 0 : index
    %14 = vector.load %arg6[%c0_11, %c0_12] : memref<2x10xf32, #tpu.memory_space<vmem>>, vector<2x10xf32>
    tpu.vector_store %arg6[%c0_11, %c0_12], %13 {strides = array<i32>} : memref<2x10xf32, #tpu.memory_space<vmem>>, vector<2x10xf32>,
    return
  }
  func.func @transform_0(%arg0: i32) -> (i32, i32) {
    %c0_i32 = arith.constant 0 : i32
    %c0_i32_0 = arith.constant 0 : i32
    return %arg0, %c0_i32 : i32, i32
  }
  func.func @transform_1(%arg0: i32) -> (i32, i32) {
    %c0_i32 = arith.constant 0 : i32
    %c0_i32_0 = arith.constant 0 : i32
    %c0_i32_1 = arith.constant 0 : i32
    return %c0_i32, %c0_i32_0 : i32, i32
  }
  func.func @transform_2(%arg0: i32) -> (i32, i32) {
    %c0_i32 = arith.constant 0 : i32
    %c0_i32_0 = arith.constant 0 : i32
    %c0_i32_1 = arith.constant 0 : i32
    return %c0_i32, %c0_i32_0 : i32, i32
  }
  func.func @transform_3(%arg0: i32) -> (i32, i32) {
    %c0_i32 = arith.constant 0 : i32
    %c0_i32_0 = arith.constant 0 : i32
    %c0_i32_1 = arith.constant 0 : i32
    return %c0_i32, %c0_i32_0 : i32, i32
  }
  func.func @transform_4(%arg0: i32) -> (i32, i32) {
    %c0_i32 = arith.constant 0 : i32
    %c0_i32_0 = arith.constant 0 : i32
    %c0_i32_1 = arith.constant 0 : i32
    return %c0_i32, %c0_i32_0 : i32, i32
  }
  func.func @transform_5(%arg0: i32) -> (i32, i32) {
    %c0_i32 = arith.constant 0 : i32
    %c0_i32_0 = arith.constant 0 : i32
    return %arg0, %c0_i32 : i32, i32
  }
}

</mosaic_0001>

<bundles_post_ra>
// kernel: cnn2_forward.3
= control target key start
LH: loop header
LB: loop body
LE: loop exit
PB: predicated region body
PF: predicated region fallthrough
CT: control target
= control target key end

     0   :  { %v19_v0 = vlaneseq  ;;  %s2193_s16 = smov 126   ;;  %s2194_s17 = smov 125   ;;  %v3658_v46 = vmov 0   ;;  %vm3643_vm0 = vcmask 1039360   ;;  %vm3663_vm1 = vcmask 1040384   ;;  %s3633_s0 = inlined_call_operand.vmem [shape: f32[1,1,1696], index: 0, kind: input, shape index: {}]   ;;  %s3634_s1 = inlined_call_operand.vmem [shape: bf16[20,16], index: 1, kind: input, shape index: {}]   ;;  %s3635_s2 = inlined_call_operand.vmem [shape: f32[20,1], index: 2, kind: input, shape index: {}]   ;;  %s3636_s3 = inlined_call_operand.vmem [shape: bf16[1,20,1568], index: 3, kind: output, shape index: {}]  }
   0x1   :  { %v15_v2 = vld [vmem:[%s3633_s0] sm:$0xff]  ;;  %v16_v15 = vld [vmem:[%s3633_s0 + $0x8] sm:$0x3f]  ;;  %s2192_s0 = smov 127   ;;  %s2195_s18 = smov 72   ;;  %1134 = vmatprep.mubr.bf16.mxu0 %v3658_v46  ;;  %1185 = vmatprep.mubr.bf16.mxu1 %v3658_v46  ;;  %vm3641_vm2 = vcmask 1031168  }
   0x2   :  { %v20_v1 = vshrl.u32 %v19_v0, 7  ;;  %s2196_s19 = smov 71   ;;  %s2197_s20 = smov 70   ;;  %2189 = vset.pattern.permute.xlu0 %v3658_v46  ;;  %2188 = vset.pattern.permute.xlu1 %v3658_v46  ;;  %vm3644_vm3 = vcmask 1041408   ;;  %vm3640_vm4 = vcmask 1022976   ;;  %vm892_vm5 = vcmask 1042432  }
   0x3   :  { %s2198_s21 = smov 69   ;;  %s2199_s22 = smov 100   ;;  %vm474_vm6 = vcmask 588800   ;;  %vm526_vm7 = vcmask 580608   ;;  %vm3655_vm8 = vcmask 572416   ;;  %vm3642_vm9 = vcmask 564224  }
   0x4   :  { %v37_v3 = vsub.s32 4, %v20_v1  ;;  %v41_v4 = vsub.s32 5, %v20_v1  ;;  %v21_v5 = vsub.s32 0, %v20_v1  ;;  %v25_v6 = vsub.s32 1, %v20_v1  ;;  %s2200_s23 = smov 44   ;;  %s2201_s24 = smov 99  }
   0x5   :  { %v45_v7 = vsub.s32 6, %v20_v1  ;;  %v49_v8 = vsub.s32 7, %v20_v1  ;;  %v29_v9 = vsub.s32 2, %v20_v1  ;;  %v33_v10 = vsub.s32 3, %v20_v1  ;;  %s2202_s25 = smov 43   ;;  %s2203_s26 = smov 98  }
   0x6   :  { %v2231_v11 = vrot.slane %v15_v2, %v37_v3  ;;  %v2233_v12 = vrot.slane %v15_v2, %v41_v4  ;;  %v2235_v13 = vrot.slane %v15_v2, %v21_v5  ;;  %v2237_v14 = vrot.slane %v15_v2, %v25_v6  ;;  %s2204_s27 = smov 42   ;;  %s2205_s28 = smov 97  }
   0x7   :  { %v2242_v16 = vrot.slane %v15_v2, %v45_v7  ;;  %v2244_v17 = vrot.slane %v15_v2, %v49_v8  ;;  %v2246_v18 = vrot.slane %v15_v2, %v29_v9  ;;  %v2248_v19 = vrot.slane %v15_v2, %v33_v10  ;;  %s2206_s29 = smov 41  }
   0x8   :  { %v2252_v20 = vpack.i.bf16 %v2233_v12, %v2231_v11  ;;  %v1738_v21 = vpack.i.bf16 %v2237_v14, %v2235_v13  ;;  %v2260_v23 = vrot.slane %v16_v15, %v29_v9  ;;  %v2262_v24 = vrot.slane %v16_v15, %v33_v10 }
   0x9   :  { %v2258_v22 = vpack.i.bf16 %v2244_v17, %v2242_v16  ;;  %v1743_v25 = vpack.i.bf16 %v2248_v19, %v2246_v18  ;;  %v2267_v26 = vrot.slane %v16_v15, %v21_v5  ;;  %v2269_v27 = vrot.slane %v16_v15, %v25_v6 }
   0xa   :  { %1749 = vrot.lane.b32.xlu1 %v2252_v20, %s2192_s0  ;;  %1739 = vrot.lane.b32.xlu0 %v1738_v21, %s2192_s0  ;;  %v2274_v28 = vpack.i.bf16 %v2262_v24, %v2260_v23  ;;  %v2282_v30 = vrot.slane %v16_v15, %v37_v3  ;;  %v1828_v31 = vpack.i.bf16 %v2246_v18, %v2237_v14  ;;  %vm3646_vm10 = vcmask 818176  }
   0xb   :  { %v2278_v29 = vpack.i.bf16 %v2269_v27, %v2267_v26  ;;  %v1838_v32 = vpack.i.bf16 %v2248_v19, %v2235_v13  ;;  %vm682_vm11 = vcmask 359424   ;;  %vm906_vm12 = vcmask 1043456  }
   0xc   :  { %vm318_vm13 = vcmask 809984   ;;  %vm734_vm14 = vcmask 351232   ;;  %vm920_vm15 = vcmask 1044480  }
   0xe   :  { %1754 = vrot.lane.b32.xlu1 %v2258_v22, %s2192_s0  ;;  %1744 = vrot.lane.b32.xlu0 %v1743_v25, %s2192_s0 }
  0x12   :  { %1764 = vrot.lane.b32.xlu1 %v2274_v28, %s2192_s0  ;;  %1759 = vrot.lane.b32.xlu0 %v2278_v29, %s2192_s0 }
  0x16   :  { %1769 = vrot.lane.b32.xlu1 %v1738_v21, %s2193_s16  ;;  %108 = vrot.lane.b32.xlu0 %v2282_v30, %s2192_s0 }
  0x1a   :  { %1779 = vrot.lane.b32.xlu1 %v2252_v20, %s2193_s16  ;;  %1774 = vrot.lane.b32.xlu0 %v1743_v25, %s2193_s16 }
  0x1e   :  { %1789 = vrot.lane.b32.xlu1 %v2278_v29, %s2193_s16  ;;  %1784 = vrot.lane.b32.xlu0 %v2258_v22, %s2193_s16 }
  0x22   :  { %160 = vrot.lane.b32.xlu1 %v2282_v30, %s2193_s16  ;;  %1794 = vrot.lane.b32.xlu0 %v2274_v28, %s2193_s16 }
  0x26   :  { %1804 = vrot.lane.b32.xlu1 %v1743_v25, %s2194_s17  ;;  %1799 = vrot.lane.b32.xlu0 %v1738_v21, %s2194_s17 }
  0x2a   :  { %1814 = vrot.lane.b32.xlu1 %v2258_v22, %s2194_s17  ;;  %1809 = vrot.lane.b32.xlu0 %v2252_v20, %s2194_s17 }
  0x2e   :  { %1824 = vrot.lane.b32.xlu1 %v2274_v28, %s2194_s17  ;;  %1819 = vrot.lane.b32.xlu0 %v2278_v29, %s2194_s17 }
  0x32   :  { %1829 = vrot.lane.b32.xlu1 %v1828_v31, %s2195_s18  ;;  %212 = vrot.lane.b32.xlu0 %v2282_v30, %s2194_s17 }
  0x36   :  { %1839 = vrot.lane.b32.xlu1 %v1838_v32, %s2195_s18  ;;  %1834 = vrot.lane.b32.xlu0 %v1828_v31, %s2196_s19 }
  0x3a   :  { %1849 = vrot.lane.b32.xlu1 %v1828_v31, %s2197_s20  ;;  %1844 = vrot.lane.b32.xlu0 %v1838_v32, %s2196_s19 }
  0x3e   :  { %1859 = vrot.lane.b32.xlu1 %v1828_v31, %s2198_s21  ;;  %1854 = vrot.lane.b32.xlu0 %v1838_v32, %s2197_s20 }
  0x42   :  { %1869 = vrot.lane.b32.xlu1 %v1838_v32, %s2198_s21  ;;  %1864 = vrot.lane.b32.xlu0 %v1828_v31, %s2199_s22 }
  0x46   :  { %1879 = vrot.lane.b32.xlu1 %v1838_v32, %s2199_s22  ;;  %1874 = vrot.lane.b32.xlu0 %v1828_v31, %s2200_s23 }
  0x4a   :  { %1889 = vrot.lane.b32.xlu1 %v1838_v32, %s2200_s23  ;;  %1884 = vrot.lane.b32.xlu0 %v1828_v31, %s2201_s24 }
  0x4e   :  { %1899 = vrot.lane.b32.xlu1 %v1838_v32, %s2201_s24  ;;  %1894 = vrot.lane.b32.xlu0 %v1828_v31, %s2202_s25 }
  0x52   :  { %1909 = vrot.lane.b32.xlu1 %v1838_v32, %s2202_s25  ;;  %1904 = vrot.lane.b32.xlu0 %v1828_v31, %s2203_s26 }
  0x56   :  { %1919 = vrot.lane.b32.xlu1 %v1838_v32, %s2203_s26  ;;  %1914 = vrot.lane.b32.xlu0 %v1828_v31, %s2204_s27 }
  0x5a   :  { %1929 = vrot.lane.b32.xlu1 %v1838_v32, %s2204_s27  ;;  %1924 = vrot.lane.b32.xlu0 %v1828_v31, %s2205_s28 }
  0x5e   :  { %1939 = vrot.lane.b32.xlu1 %v1838_v32, %s2205_s28  ;;  %1934 = vrot.lane.b32.xlu0 %v1828_v31, %s2206_s29 }
  0x62   :  { %1949 = vrot.lane.b32.xlu1 %v2252_v20, %s2195_s18  ;;  %1944 = vrot.lane.b32.xlu0 %v1838_v32, %s2206_s29 }
  0x66   :  { %1959 = vrot.lane.b32.xlu1 %v2252_v20, %s2197_s20  ;;  %1954 = vrot.lane.b32.xlu0 %v2252_v20, %s2196_s19 }
  0x6a   :  { %1969 = vrot.lane.b32.xlu1 %v2252_v20, %s2199_s22  ;;  %1964 = vrot.lane.b32.xlu0 %v2252_v20, %s2198_s21 }
  0x6e   :  { %1979 = vrot.lane.b32.xlu1 %v2252_v20, %s2201_s24  ;;  %1974 = vrot.lane.b32.xlu0 %v2252_v20, %s2200_s23 }
  0x72   :  { %1989 = vrot.lane.b32.xlu1 %v2258_v22, %s2196_s19  ;;  %1984 = vrot.lane.b32.xlu0 %v2258_v22, %s2195_s18 }
  0x76   :  { %1999 = vrot.lane.b32.xlu1 %v2252_v20, %s2203_s26  ;;  %1994 = vrot.lane.b32.xlu0 %v2252_v20, %s2202_s25 }
  0x7a   :  { %2009 = vrot.lane.b32.xlu1 %v2252_v20, %s2204_s27  ;;  %2004 = vrot.lane.b32.xlu0 %v2258_v22, %s2197_s20 }
  0x7c   :  { %v2349_v33 = vpop.permute.xlu1 %1749  ;;  %v2351_v34 = vpop.permute.xlu0 %1739 }
  0x7d   :  { %v3652_v15 = vunpack.i.h.bf16 %v2349_v33 }
  0x7e   :  { %2019 = vrot.lane.b32.xlu1 %v2258_v22, %s2198_s21  ;;  %2014 = vrot.lane.b32.xlu0 %v2252_v20, %s2205_s28 }
  0x80   :  { %v2357_v35 = vpop.permute.xlu1 %1754  ;;  %v2359_v36 = vpop.permute.xlu0 %1744 }
  0x81   :  { %v1757_v41 = vunpack.i.h.bf16 %v2357_v35  ;;  %v1756_v47 = vunpack.i.l.bf16 %v2357_v35 }
  0x82   :  { %2029 = vrot.lane.b32.xlu1 %v2258_v22, %s2199_s22  ;;  %2024 = vrot.lane.b32.xlu0 %v2252_v20, %s2206_s29 }
  0x83   :  { %v117_v48 = vsel %vm3643_vm0, %v1756_v47, %v1757_v41 }
  0x84   :  { %v1765_v37 = vpop.permute.xlu1 %1764  ;;  %v1760_v38 = vpop.permute.xlu0 %1759  ;;  %v871_v59 = vsel %vm3663_vm1, %v2242_v16, %v117_v48 }
  0x85   :  { %v1762_v42 = vunpack.i.h.bf16 %v1760_v38  ;;  %v1761_v43 = vunpack.i.l.bf16 %v1760_v38  ;;  %v1767_v49 = vunpack.i.h.bf16 %v1765_v37  ;;  %v1766_v53 = vunpack.i.l.bf16 %v1765_v37 }
  0x86   :  { %2039 = vrot.lane.b32.xlu1 %v2258_v22, %s2201_s24  ;;  %2034 = vrot.lane.b32.xlu0 %v2258_v22, %s2200_s23  ;;  %v116_v38 = vsel %vm3643_vm0, %v3652_v15, %v1756_v47 }
  0x87   :  { %v119_v50 = vsel %vm3643_vm0, %v1761_v43, %v1762_v42  ;;  %v118_v54 = vsel %vm3643_vm0, %v1757_v41, %v1761_v43  ;;  %v121_v60 = vsel %vm3643_vm0, %v1766_v53, %v1767_v49  ;;  %v120_v5 = vsel %vm3643_vm0, %v1762_v42, %v1766_v53 }
  0x88   :  { %v2369_v39 = vpop.permute.xlu1 %1769  ;;  %v2371_v40 = vpop.permute.xlu0 %108  ;;  %v873_v61 = vsel %vm3663_vm1, %v2267_v26, %v119_v50  ;;  %v872_v63 = vsel %vm3663_vm1, %v2244_v17, %v118_v54  ;;  %v875_v16 = vsel %vm3663_vm1, %v2260_v23, %v121_v60  ;;  %v874_v17 = vsel %vm3663_vm1, %v2269_v27, %v120_v5 }
  0x89   :  { %v122_v8 = vsel %vm3643_vm0, %v1767_v49, %v2371_v40  ;;  %v870_v47 = vsel %vm3663_vm1, %v2233_v12, %v116_v38 }
  0x8a   :  { %2049 = vrot.lane.b32.xlu1 %v2258_v22, %s2203_s26  ;;  %2044 = vrot.lane.b32.xlu0 %v2258_v22, %s2202_s25  ;;  %v876_v31 = vsel %vm3663_vm1, %v2262_v24, %v122_v8 }
  0x8c   :  { %v2378_v44 = vpop.permute.xlu1 %1779  ;;  %v2380_v45 = vpop.permute.xlu0 %1774 }
  0x8d   :  { %v3639_v37 = vunpack.i.h.bf16 %v2378_v44 }
  0x8e   :  { %2059 = vrot.lane.b32.xlu1 %v2258_v22, %s2205_s28  ;;  %2054 = vrot.lane.b32.xlu0 %v2258_v22, %s2204_s27 }
  0x90   :  { %v1790_v51 = vpop.permute.xlu1 %1789  ;;  %v1785_v52 = vpop.permute.xlu0 %1784 }
  0x91   :  { %v1792_v55 = vunpack.i.h.bf16 %v1790_v51  ;;  %v1791_v56 = vunpack.i.l.bf16 %v1790_v51  ;;  %v1787_v57 = vunpack.i.h.bf16 %v1785_v52  ;;  %v1786_v58 = vunpack.i.l.bf16 %v1785_v52 }
  0x92   :  { %2069 = vrot.lane.b32.xlu1 %v2278_v29, %s2195_s18  ;;  %2064 = vrot.lane.b32.xlu0 %v2258_v22, %s2206_s29 }
  0x93   :  { %v171_v62 = vsel %vm3641_vm2, %v1791_v56, %v1792_v55  ;;  %v170_v1 = vsel %vm3641_vm2, %v1787_v57, %v1791_v56  ;;  %v169_v2 = vsel %vm3641_vm2, %v1786_v58, %v1787_v57  ;;  %v168_v43 = vsel %vm3641_vm2, %v3639_v37, %v1786_v58 }
  0x94   :  { %v2407_v0 = vsel %vm3644_vm3, %v873_v61, %v171_v62  ;;  %v161_v3 = vpop.permute.xlu1 %160  ;;  %v1795_v4 = vpop.permute.xlu0 %1794  ;;  %v885_v6 = vsel %vm3644_vm3, %v871_v59, %v169_v2  ;;  %v886_v7 = vsel %vm3644_vm3, %v872_v63, %v170_v1  ;;  %v884_v54 = vsel %vm3644_vm3, %v870_v47, %v168_v43 }
  0x95   :  { %v1797_v9 = vunpack.i.h.bf16 %v1795_v4  ;;  %v1796_v10 = vunpack.i.l.bf16 %v1795_v4  ;;  %v877_v61 = vsel %vm3663_vm1, %v2282_v30, %v2371_v40 }
  0x96   :  { %2079 = vrot.lane.b32.xlu1 %v2278_v29, %s2197_s20  ;;  %2074 = vrot.lane.b32.xlu0 %v2278_v29, %s2196_s19  ;;  %v891_v2 = vsel %vm3644_vm3, %v877_v61, %v161_v3  ;;  %v1746_v61 = vunpack.i.l.bf16 %v2359_v36 }
  0x97   :  { %v174_v20 = vsel %vm3641_vm2, %v1797_v9, %v161_v3  ;;  %v172_v21 = vsel %vm3641_vm2, %v1792_v55, %v1796_v10  ;;  %v173_v22 = vsel %vm3641_vm2, %v1796_v10, %v1797_v9 }
  0x98   :  { %v2428_v25 = vpop.permute.xlu1 %1804  ;;  %v2430_v26 = vpop.permute.xlu0 %1799  ;;  %v888_v32 = vsel %vm3644_vm3, %v874_v17, %v172_v21  ;;  %v889_v35 = vsel %vm3644_vm3, %v875_v16, %v173_v22  ;;  %v890_v27 = vsel %vm3644_vm3, %v876_v31, %v174_v20 }
  0x99   :  { %v1807_v50 = vunpack.i.h.bf16 %v2428_v25 }
  0x9a   :  { %2089 = vrot.lane.b32.xlu1 %v2278_v29, %s2199_s22  ;;  %2084 = vrot.lane.b32.xlu0 %v2278_v29, %s2198_s21 }
  0x9c   :  { %v1815_v41 = vpop.permute.xlu1 %1814  ;;  %v2445_v42 = vpop.permute.xlu0 %1809 }
  0x9d   :  { %v1817_v48 = vunpack.i.h.bf16 %v1815_v41  ;;  %v1816_v49 = vunpack.i.l.bf16 %v1815_v41  ;;  %v3638_v51 = vunpack.i.h.bf16 %v2445_v42  ;;  %v3637_v52 = vunpack.i.l.bf16 %v2445_v42 }
  0x9e   :  { %2099 = vrot.lane.b32.xlu1 %v2278_v29, %s2201_s24  ;;  %2094 = vrot.lane.b32.xlu0 %v2278_v29, %s2200_s23 }
  0x9f   :  { %v221_v53 = vsel %vm3640_vm4, %v1816_v49, %v1817_v48  ;;  %v220_v56 = vsel %vm3640_vm4, %v3638_v51, %v1816_v49  ;;  %v2472_v57 = vsel %vm3640_vm4, %v1807_v50, %v3637_v52  ;;  %v1801_v52 = vunpack.i.l.bf16 %v2430_v26 }
  0xa0   :  { %v2462_v55 = vsel %vm892_vm5, %v885_v6, %v221_v53  ;;  %v1825_v12 = vpop.permute.xlu1 %1824  ;;  %v1820_v58 = vpop.permute.xlu0 %1819  ;;  %v2475_v59 = vsel %vm892_vm5, %v884_v54, %v220_v56 }
  0xa1   :  { %v1827_v60 = vunpack.i.h.bf16 %v1825_v12  ;;  %v1826_v62 = vunpack.i.l.bf16 %v1825_v12  ;;  %v1822_v63 = vunpack.i.h.bf16 %v1820_v58  ;;  %v1821_v1 = vunpack.i.l.bf16 %v1820_v58 }
  0xa2   :  { %2109 = vrot.lane.b32.xlu1 %v2274_v28, %s2196_s19  ;;  %2104 = vrot.lane.b32.xlu0 %v2274_v28, %s2195_s18  ;;  %v1742_v58 = vunpack.i.h.bf16 %v2351_v34 }
  0xa3   :  { %v225_v4 = vsel %vm3640_vm4, %v1826_v62, %v1827_v60  ;;  %v224_v5 = vsel %vm3640_vm4, %v1822_v63, %v1826_v62  ;;  %v222_v6 = vsel %vm3640_vm4, %v1817_v48, %v1821_v1  ;;  %v223_v8 = vsel %vm3640_vm4, %v1821_v1, %v1822_v63 }
  0xa4   :  { %v2489_v40 = vpop.permute.xlu1 %1829  ;;  %v213_v9 = vpop.permute.xlu0 %212  ;;  %v2492_v10 = vsel %vm892_vm5, %v889_v35, %v225_v4  ;;  %v2495_v16 = vsel %vm892_vm5, %v886_v7, %v222_v6  ;;  %v2499_v3 = vsel %vm892_vm5, %v2407_v0, %v223_v8  ;;  %v2502_v17 = vsel %vm892_vm5, %v888_v32, %v224_v5 }
  0xa5   :  { %v226_v20 = vsel %vm3640_vm4, %v1827_v60, %v213_v9  ;;  %v2506_v21 = vsel %vm892_vm5, %v891_v2, %v213_v9  ;;  %v1832_v31 = vunpack.i.h.bf16 %v2489_v40  ;;  %v1741_v60 = vunpack.i.l.bf16 %v2351_v34 }
  0xa6   :  { %2119 = vrot.lane.b32.xlu1 %v2278_v29, %s2203_s26  ;;  %2114 = vrot.lane.b32.xlu0 %v2278_v29, %s2202_s25  ;;  %v2513_v7 = vsel %vm892_vm5, %v890_v27, %v226_v20  ;;  %v1772_v2 = vunpack.i.h.bf16 %v2369_v39  ;;  %v1771_v4 = vunpack.i.l.bf16 %v2369_v39  ;;  %v3649_v5 = vunpack.i.h.bf16 %v2380_v45 }
  0xa7   :  { %v1776_v6 = vunpack.i.l.bf16 %v2380_v45  ;;  %v111_v34 = vsel %vm3643_vm0, %v1741_v60, %v1742_v58  ;;  %v112_v8 = vsel %vm3643_vm0, %v1742_v58, %v1746_v61  ;;  %v1806_v9 = vunpack.i.l.bf16 %v2428_v25 }
  0xa8   :  { %v2515_v22 = vpop.permute.xlu1 %1839  ;;  %v2517_v0 = vpop.permute.xlu0 %1834 }
  0xa9   :  { %v1842_v32 = vunpack.i.h.bf16 %v2515_v22  ;;  %v1837_v27 = vunpack.i.h.bf16 %v2517_v0  ;;  %v164_v58 = vsel %vm3641_vm2, %v1772_v2, %v1776_v6  ;;  %v165_v60 = vsel %vm3641_vm2, %v1776_v6, %v3649_v5 }
  0xaa   :  { %2129 = vrot.lane.b32.xlu1 %v2278_v29, %s2204_s27  ;;  %2124 = vrot.lane.b32.xlu0 %v2274_v28, %s2197_s20  ;;  %v1836_v6 = vunpack.i.l.bf16 %v2517_v0 }
  0xab   :  { %v477_v43 = vsel %vm474_vm6, %v1832_v31, %v1842_v32 }
  0xac   :  { %v2525_v35 = vpop.permute.xlu1 %1849  ;;  %v2527_v38 = vpop.permute.xlu0 %1844 }
  0xad   :  { %v1847_v41 = vunpack.i.h.bf16 %v2527_v38  ;;  %v1852_v54 = vunpack.i.h.bf16 %v2525_v35  ;;  %v1846_v51 = vunpack.i.l.bf16 %v2527_v38 }
  0xae   :  { %2139 = vrot.lane.b32.xlu1 %v2274_v28, %s2198_s21  ;;  %2134 = vrot.lane.b32.xlu0 %v2278_v29, %s2205_s28 }
  0xaf   :  { %v529_v48 = vsel %vm526_vm7, %v1837_v27, %v1847_v41 }
  0xb0   :  { %v964_v49 = vsel %vm3663_vm1, %v477_v43, %v529_v48  ;;  %v2546_v47 = vpop.permute.xlu1 %1859  ;;  %v2548_v53 = vpop.permute.xlu0 %1854  ;;  %v1802_v48 = vunpack.i.h.bf16 %v2430_v26  ;;  %v217_v26 = vsel %vm3640_vm4, %v1806_v9, %v1807_v50  ;;  %v1841_v50 = vunpack.i.l.bf16 %v2515_v22 }
  0xb1   :  { %v1857_v56 = vunpack.i.h.bf16 %v2548_v53 }
  0xb2   :  { %2149 = vrot.lane.b32.xlu1 %v2274_v28, %s2199_s22  ;;  %2144 = vrot.lane.b32.xlu0 %v2278_v29, %s2206_s29  ;;  %v3650_v29 = vunpack.i.h.bf16 %v2359_v36  ;;  %v215_v25 = vsel %vm3640_vm4, %v1801_v52, %v1802_v48 }
  0xb3   :  { %v581_v12 = vsel %vm3655_vm8, %v1852_v54, %v1857_v56 }
  0xb4   :  { %v2565_v62 = vsel %vm3644_vm3, %v964_v49, %v581_v12  ;;  %v2567_v63 = vpop.permute.xlu1 %1869  ;;  %v2569_v1 = vpop.permute.xlu0 %1864  ;;  %v113_v43 = vsel %vm3643_vm0, %v1746_v61, %v3650_v29  ;;  %v2593_v49 = vpack.i.bf16 %v2282_v30, %v2262_v24  ;;  %v163_v12 = vsel %vm3641_vm2, %v1771_v4, %v1772_v2 }
  0xb5   :  { %v865_v24 = vsel %vm3663_vm1, %v2235_v13, %v111_v34  ;;  %v866_v61 = vsel %vm3663_vm1, %v2237_v14, %v112_v8  ;;  %v1831_v2 = vunpack.i.l.bf16 %v2489_v40  ;;  %v867_v4 = vsel %vm3663_vm1, %v2246_v18, %v113_v43 }
  0xb6   :  { %2159 = vrot.lane.b32.xlu1 %v2274_v28, %s2201_s24  ;;  %2154 = vrot.lane.b32.xlu0 %v2274_v28, %s2200_s23  ;;  %v879_v13 = vsel %vm3644_vm3, %v865_v24, %v163_v12  ;;  %v880_v14 = vsel %vm3644_vm3, %v866_v61, %v164_v58  ;;  %v881_v34 = vsel %vm3644_vm3, %v867_v4, %v165_v60  ;;  %v1851_v8 = vunpack.i.l.bf16 %v2525_v35 }
  0xb7   :  { %v216_v18 = vsel %vm3640_vm4, %v1802_v48, %v1806_v9  ;;  %v1856_v43 = vunpack.i.l.bf16 %v2548_v53  ;;  %v2634_v12 = vsel %vm892_vm5, %v881_v34, %v217_v26  ;;  %v476_v52 = vsel %vm474_vm6, %v1831_v2, %v1832_v31 }
  0xb8   :  { %v2583_v20 = vpop.permute.xlu1 %1879  ;;  %v2585_v39 = vpop.permute.xlu0 %1874  ;;  %v1862_v9 = vunpack.i.h.bf16 %v2546_v47  ;;  %v1861_v48 = vunpack.i.l.bf16 %v2546_v47  ;;  %v528_v58 = vsel %vm526_vm7, %v1836_v6, %v1837_v27  ;;  %v527_v60 = vsel %vm526_vm7, %v1846_v51, %v1836_v6 }
  0xb9   :  { %v3648_v24 = vunpack.i.h.bf16 %v2567_v63  ;;  %v1871_v61 = vunpack.i.l.bf16 %v2567_v63  ;;  %v893_v31 = vsel %vm892_vm5, %v879_v13, %v215_v25  ;;  %v894_v26 = vsel %vm892_vm5, %v880_v14, %v216_v18 }
  0xba   :  { %2169 = vrot.lane.b32.xlu1 %v2274_v28, %s2203_s26  ;;  %2164 = vrot.lane.b32.xlu0 %v2274_v28, %s2202_s25  ;;  %v1867_v47 = vunpack.i.h.bf16 %v2569_v1  ;;  %v1866_v0 = vunpack.i.l.bf16 %v2569_v1  ;;  %v475_v27 = vsel %vm474_vm6, %v1841_v50, %v1831_v2  ;;  %v580_v51 = vsel %vm3655_vm8, %v1851_v8, %v1852_v54 }
  0xbb   :  { %v579_v6 = vsel %vm3655_vm8, %v1856_v43, %v1851_v8  ;;  %v1881_v34 = vunpack.i.l.bf16 %v2583_v20  ;;  %v963_v1 = vsel %vm3663_vm1, %v476_v52, %v528_v58  ;;  %v962_v13 = vsel %vm3663_vm1, %v475_v27, %v527_v60 }
  0xbc   :  { %v2617_v28 = vpop.permute.xlu1 %1889  ;;  %v2619_v37 = vpop.permute.xlu0 %1884  ;;  %v632_v2 = vsel %vm3642_vm9, %v1861_v48, %v1862_v9  ;;  %v3645_v35 = vunpack.i.h.bf16 %v2583_v20  ;;  %vm3667_vm4 = vcmask 801792   ;;  %v631_v54 = vsel %vm3642_vm9, %v1871_v61, %v1861_v48 }
  0xbd   :  { %v633_v14 = vsel %vm3642_vm9, %v1862_v9, %v3648_v24  ;;  %v1877_v18 = vunpack.i.h.bf16 %v2585_v39  ;;  %v976_v8 = vsel %vm3644_vm3, %v963_v1, %v580_v51  ;;  %v975_v43 = vsel %vm3644_vm3, %v962_v13, %v579_v6 }
  0xbe   :  { %416 = vrot.lane.b32.xlu1 %v2260_v23, %s2205_s28  ;;  %780 = vrot.lane.b32.xlu0 %v2260_v23, %s2204_s27  ;;  %v268_v52 = vsel %vm3646_vm10, %v1866_v0, %v1867_v47  ;;  %v1891_v48 = vunpack.i.l.bf16 %v2617_v28  ;;  %vm3668_vm2 = vcmask 343040   ;;  %v267_v58 = vsel %vm3646_vm10, %v1881_v34, %v1866_v0 }
  0xbf   :  { %v3647_v9 = vunpack.i.h.bf16 %v2617_v28  ;;  %v1887_v60 = vunpack.i.h.bf16 %v2619_v37  ;;  %vm3657_vm9 = vcmask 1045504   ;;  %v989_v61 = vsel %vm892_vm5, %v976_v8, %v632_v2 }
  0xc0   :  { %v2647_v4 = vpop.permute.xlu1 %1899  ;;  %v2649_v40 = vpop.permute.xlu0 %1894  ;;  %v988_v27 = vsel %vm892_vm5, %v975_v43, %v631_v54  ;;  %v990_v0 = vsel %vm892_vm5, %v2565_v62, %v633_v14  ;;  %v269_v51 = vsel %vm3646_vm10, %v1867_v47, %v3645_v35  ;;  %vm3665_vm0 = vcmask 793600  }
  0xc1   :  { %v1901_v6 = vunpack.i.l.bf16 %v2647_v4  ;;  %v1897_v34 = vunpack.i.h.bf16 %v2649_v40  ;;  %v1896_v1 = vunpack.i.l.bf16 %v2649_v40  ;;  %vm3666_vm3 = vcmask 334848  }
  0xc2   :  { %472 = vrot.lane.b32.xlu1 %v2282_v30, %s2195_s18  ;;  %832 = vrot.lane.b32.xlu0 %v2260_v23, %s2206_s29  ;;  %v1876_v23 = vunpack.i.l.bf16 %v2585_v39  ;;  %v1886_v39 = vunpack.i.l.bf16 %v2619_v37  ;;  %v907_v54 = vsel %vm906_vm12, %v893_v31, %v267_v58  ;;  %v3651_v14 = vunpack.i.h.bf16 %v2647_v4 }
  0xc3   :  { %v908_v47 = vsel %vm906_vm12, %v894_v26, %v268_v52  ;;  %v685_v8 = vsel %vm682_vm11, %v1877_v18, %v3647_v9  ;;  %vm3654_vm10 = vcmask 1046528   ;;  %v909_v31 = vsel %vm906_vm12, %v2634_v12, %v269_v51 }
  0xc4   :  { %v2675_v25 = vpop.permute.xlu1 %1909  ;;  %v2677_v50 = vpop.permute.xlu0 %1904  ;;  %v684_v37 = vsel %vm682_vm11, %v1876_v23, %v1877_v18  ;;  %v683_v62 = vsel %vm682_vm11, %v1891_v48, %v1876_v23  ;;  %v320_v43 = vsel %vm318_vm13, %v1886_v39, %v1887_v60  ;;  %v319_v52 = vsel %vm318_vm13, %v1901_v6, %v1886_v39 }
  0xc5   :  { %v1907_v40 = vunpack.i.h.bf16 %v2677_v50  ;;  %v1906_v35 = vunpack.i.l.bf16 %v2677_v50  ;;  %v3653_v26 = vunpack.i.h.bf16 %v2675_v25  ;;  %v1911_v18 = vunpack.i.l.bf16 %v2675_v25 }
  0xc6   :  { %576 = vrot.lane.b32.xlu1 %v2282_v30, %s2197_s20  ;;  %524 = vrot.lane.b32.xlu0 %v2282_v30, %s2196_s19  ;;  %v1002_v23 = vsel %vm906_vm12, %v989_v61, %v684_v37  ;;  %v736_v50 = vsel %vm734_vm14, %v1896_v1, %v1897_v34  ;;  %v1001_v5 = vsel %vm906_vm12, %v988_v27, %v683_v62 }
  0xc7   :  { %v1003_v29 = vsel %vm906_vm12, %v990_v0, %v685_v8  ;;  %v321_v12 = vsel %vm318_vm13, %v1887_v60, %v3651_v14  ;;  %v922_v51 = vsel %vm920_vm15, %v908_v47, %v320_v43  ;;  %v372_v27 = vsel %vm3667_vm4, %v1906_v35, %v1907_v40 }
  0xc8   :  { %v2702_v13 = vpop.permute.xlu1 %1919  ;;  %v1915_v2 = vpop.permute.xlu0 %1914  ;;  %v735_v0 = vsel %vm734_vm14, %v1911_v18, %v1896_v1  ;;  %v737_v60 = vsel %vm734_vm14, %v1897_v34, %v3653_v26  ;;  %v1015_v6 = vsel %vm920_vm15, %v1002_v23, %v736_v50  ;;  %v936_v15 = vsel %vm3657_vm9, %v922_v51, %v372_v27 }
  0xc9   :  { %v1917_v48 = vunpack.i.h.bf16 %v1915_v2  ;;  %v1916_v58 = vunpack.i.l.bf16 %v1915_v2  ;;  %v921_v2 = vsel %vm920_vm15, %v907_v54, %v319_v52  ;;  %v1921_v62 = vunpack.i.l.bf16 %v2702_v13 }
  0xca   :  { %264 = vrot.lane.b32.xlu1 %v2282_v30, %s2199_s22  ;;  %628 = vrot.lane.b32.xlu0 %v2282_v30, %s2198_s21  ;;  %v923_v34 = vsel %vm920_vm15, %v909_v31, %v321_v12  ;;  %v1014_v31 = vsel %vm920_vm15, %v1001_v5, %v735_v0 }
  0xcb   :  { %v788_v14 = vsel %vm3668_vm2, %v1916_v58, %v1917_v48  ;;  %v371_v12 = vsel %vm3667_vm4, %v1921_v62, %v1906_v35 }
  0xcc   :  { %v2725_v9 = vpop.permute.xlu1 %1929  ;;  %v1925_v24 = vpop.permute.xlu0 %1924  ;;  %v1028_v51 = vsel %vm3657_vm9, %v1015_v6, %v788_v14 }
  0xcd   :  { %v1931_v61 = vunpack.i.l.bf16 %v2725_v9  ;;  %v1927_v39 = vunpack.i.h.bf16 %v1925_v24  ;;  %v1926_v37 = vunpack.i.l.bf16 %v1925_v24  ;;  %v3664_v24 = vunpack.i.h.bf16 %v2702_v13 }
  0xce   :  { %316 = vrot.lane.b32.xlu1 %v2282_v30, %s2201_s24  ;;  %680 = vrot.lane.b32.xlu0 %v2282_v30, %s2200_s23  ;;  %v1932_v47 = vunpack.i.h.bf16 %v2725_v9 }
  0xcf   :  { %v787_v23 = vsel %vm3668_vm2, %v1931_v61, %v1916_v58  ;;  %v424_v50 = vsel %vm3665_vm0, %v1926_v37, %v1927_v39  ;;  %v1016_v58 = vsel %vm920_vm15, %v1003_v29, %v737_v60  ;;  %v373_v61 = vsel %vm3667_vm4, %v1907_v40, %v3664_v24 }
  0xd0   :  { %v2748_v8 = vpop.permute.xlu1 %1939  ;;  %v1935_v43 = vpop.permute.xlu0 %1934  ;;  %v950_v35 = vsel %vm3654_vm10, %v936_v15, %v424_v50  ;;  %v1027_v0 = vsel %vm3657_vm9, %v1014_v31, %v787_v23 }
  0xd1   :  { %v1937_v1 = vunpack.i.h.bf16 %v1935_v43  ;;  %v1936_v18 = vunpack.i.l.bf16 %v1935_v43  ;;  %v3662_v54 = vunpack.i.h.bf16 %v2748_v8  ;;  %v1941_v52 = vunpack.i.l.bf16 %v2748_v8 }
  0xd2   :  { %368 = vrot.lane.b32.xlu1 %v2282_v30, %s2203_s26  ;;  %732 = vrot.lane.b32.xlu0 %v2282_v30, %s2202_s25  ;;  %v789_v30 = vsel %vm3668_vm2, %v1917_v48, %v1932_v47  ;;  %v3689_v9 = vunpack.i.h.bf16 %v2748_v8 }
  0xd3   :  { %v840_v43 = vsel %vm3666_vm3, %v1936_v18, %v1937_v1  ;;  %v423_v48 = vsel %vm3665_vm0, %v1941_v52, %v1926_v37  ;;  %v425_v60 = vsel %vm3665_vm0, %v1927_v39, %v3662_v54  ;;  %v1029_v23 = vsel %vm3657_vm9, %v1016_v58, %v789_v30  ;;  %v2833_v30 = vld [vmem:[%s3634_s1] sm:$0xff]  }
  0xd4   :  { %v2772_v27 = vpop.permute.xlu1 %1949  ;;  %v2774_v26 = vpop.permute.xlu0 %1944  ;;  %v1041_v14 = vsel %vm3654_vm10, %v1028_v51, %v840_v43  ;;  %v935_v37 = vsel %vm3657_vm9, %v921_v2, %v371_v12  ;;  %v937_v39 = vsel %vm3657_vm9, %v923_v34, %v373_v61  ;;  %vm3675_vm9 = vcmask 1031168  }
  0xd5   :  { %v3661_v5 = vunpack.i.h.bf16 %v2774_v26  ;;  %v1946_v29 = vunpack.i.l.bf16 %v2774_v26  ;;  %v1057_v40 = vpack.c.bf16 %v1041_v14, %v950_v35  ;;  %v1951_v6 = vunpack.i.l.bf16 %v2772_v27  ;;  %v1071_v35 = vld [vmem:[%s3635_s2 + $0x10] sm:$0xf] }
  0xd6   :  { %2179 = vrot.lane.b32.xlu1 %v2593_v49, %s2205_s28  ;;  %2174 = vrot.lane.b32.xlu0 %v2593_v49, %s2204_s27  ;;  %v949_v31 = vsel %vm3654_vm10, %v935_v37, %v423_v48  ;;  %v2809_v58 = vsel %vm3654_vm10, %v937_v39, %v425_v60  ;;  %v3670_v39 = vunpack.i.h.bf16 %v2349_v33  ;;  %v3681_v54 = vunpack.i.l.bf16 %v2445_v42 }
  0xd7   :  { %v839_v62 = vsel %vm3666_vm3, %v1946_v29, %v1936_v18  ;;  %v841_v15 = vsel %vm3666_vm3, %v1937_v1, %v3661_v5  ;;  %1116 = vmatprep.subr.bf16.mxu0 %v1057_v40  ;;  %v478_v34 = vsel %vm474_vm6, %v1842_v32, %v1951_v6  ;;  %v1070_v29 = vld [vmem:[%s3635_s2 + $0x8] sm:$0xff]  ;;  %v3677_v5 = vunpack.i.h.bf16 %v2567_v63 }
  0xd8   :  { %v2795_v50 = vpop.permute.xlu1 %1959  ;;  %v2797_v43 = vpop.permute.xlu0 %1954  ;;  %v1040_v52 = vsel %vm3654_vm10, %v1027_v0, %v839_v62  ;;  %v2803_v51 = vsel %vm3654_vm10, %v1029_v23, %v841_v15  ;;  %vm3656_vm10 = vcmask 130048   ;;  %v2860_v0 = vld [vmem:[%s3634_s1 + $0x8] ss:$0 sps:$4 sm:$0x33]   ;;  %v1751_v15 = vunpack.i.l.bf16 %v2349_v33 }
  0xd9   :  { %v3660_v18 = vunpack.i.l.bf16 %v2795_v50  ;;  %v1956_v1 = vunpack.i.l.bf16 %v2797_v43  ;;  %v1056_v2 = vpack.c.bf16 %v1040_v52, %v949_v31  ;;  %v1781_v23 = vunpack.i.l.bf16 %v2378_v44 }
  0xda   :  { %2184 = vrot.lane.b32.xlu0 %v2593_v49, %s2206_s29  ;;  %v3692_v8 = vunpack.i.l.bf16 %v2795_v50 }
  0xdb   :  { %v582_v61 = vsel %vm3655_vm8, %v1857_v56, %v3660_v18  ;;  %v530_v49 = vsel %vm526_vm7, %v1847_v41, %v1956_v1  ;;  %1117 = vmatpush1.bf16.msra.mxu0 %v1056_v2  ;;  %vm3669_vm8 = vcmask 1041408   ;;  %v1069_v56 = vld [vmem:[%s3635_s2] sm:$0xff]  ;;  %v3672_v2 = vunpack.i.h.bf16 %v2359_v36 }
  0xdc   :  { %v965_v22 = vsel %vm3663_vm1, %v478_v34, %v530_v49  ;;  %v2836_v32 = vpop.permute.xlu1 %1969  ;;  %v2838_v14 = vpop.permute.xlu0 %1964  ;;  %1074 = vperm.xlu1 %2188, %v1069_v56   ;;  %v1957_v18 = vunpack.i.h.bf16 %v2797_v43 }
  0xdd   :  { %v978_v53 = vsel %vm3669_vm8, %v965_v22, %v582_v61  ;;  %vm3671_vm8 = vcmask 1039360   ;;  %v1966_v61 = vunpack.i.l.bf16 %v2838_v14  ;;  %v3674_v22 = vunpack.i.h.bf16 %v2380_v45 }
  0xde   :  { %1657 = vmatmul.mubr.msk.bf16.vlgmr.msra.gmra.mxu0 %vm3656_vm10, %v2833_v30  ;;  %1079 = vperm.xlu0 %2189, %v1070_v29   ;;  %v115_v31 = vsel %vm3671_vm8, %v1751_v15, %v3670_v39  ;;  %v1952_v29 = vunpack.i.h.bf16 %v2772_v27 }
  0xdf   :  { %1144 = vmatprep.mubr.bf16.mxu0 %v3658_v46  ;;  %v166_v56 = vsel %vm3675_vm9, %v3674_v22, %v1781_v23  ;;  %v869_v39 = vsel %vm3663_vm1, %v2231_v11, %v115_v31  ;;  %v3676_v22 = vunpack.i.h.bf16 %v2378_v44  ;;  %v3683_v44 = vunpack.i.h.bf16 %v2617_v28 }
  0xe0   :  { %v2843_v38 = vpop.permute.xlu1 %1979  ;;  %v2845_v41 = vpop.permute.xlu0 %1974  ;;  %1084 = vperm.xlu1 %2188, %v1071_v35   ;;  %v1971_v35 = vunpack.i.l.bf16 %v2836_v32  ;;  %v3686_v28 = vunpack.i.h.bf16 %v2675_v25 }
  0xe1   :  { %v1976_v49 = vunpack.i.l.bf16 %v2845_v41  ;;  %v167_v12 = vsel %vm3675_vm9, %v1781_v23, %v3676_v22  ;;  %vm3685_vm9 = vcmask 818176  }
  0xe3   :  { %v686_v23 = vsel %vm682_vm11, %v3683_v44, %v1976_v49 }
  0xe4   :  { %v2862_v40 = vpop.permute.xlu1 %1989  ;;  %v2864_v48 = vpop.permute.xlu0 %1984 }
  0xe6   :  { %1658 = vmatmul.mubr.msk.bf16.gmra.mxu0 %vm3656_vm10, %v2860_v0  ;;  %vm3673_vm10 = vmmov %vm3671_vm8  ;;  %vm3679_vm8 = vcmask 1041408  }
  0xe7   :  { %1236 = vmatprep.mubr.bf16.mxu0 %v3658_v46  ;;  %v114_v34 = vsel %vm3673_vm10, %v3672_v2, %v1751_v15  ;;  %v1981_v15 = vunpack.i.l.bf16 %v2843_v38  ;;  %vm3678_vm10 = vcmask 564224  }
  0xe8   :  { %v2868_v60 = vpop.permute.xlu1 %1999  ;;  %v2870_v62 = vpop.permute.xlu0 %1994  ;;  %v868_v36 = vsel %vm3663_vm1, %v2248_v19, %v114_v34  ;;  %v634_v11 = vsel %vm3678_vm10, %v3677_v5, %v1966_v61  ;;  %v3680_v34 = vunpack.i.h.bf16 %v2445_v42  ;;  %vm3682_vm1 = vcmask 1022976  }
  0xe9   :  { %v1996_v33 = vunpack.i.l.bf16 %v2870_v62  ;;  %v2001_v19 = vunpack.i.l.bf16 %v2868_v60  ;;  %v882_v31 = vsel %vm3679_vm8, %v868_v36, %v166_v56  ;;  %v479_v5 = vsel %vm474_vm6, %v1951_v6, %v1952_v29 }
  0xea   :  { %v219_v24 = vsel %vm3682_vm1, %v3681_v54, %v3680_v34  ;;  %v896_v63 = vsel %vm892_vm5, %v882_v31, %v2472_v57  ;;  %v3684_v56 = vunpack.i.h.bf16 %v2583_v20  ;;  %v1962_v36 = vunpack.i.h.bf16 %v2795_v50 }
  0xeb   :  { %v738_v54 = vsel %vm734_vm14, %v3686_v28, %v1996_v33  ;;  %v991_v57 = vsel %vm892_vm5, %v978_v53, %v634_v11  ;;  %v3687_v31 = vunpack.i.h.bf16 %v2647_v4  ;;  %v531_v53 = vsel %vm526_vm7, %v1956_v1, %v1957_v18 }
  0xec   :  { %v2875_v37 = vpop.permute.xlu1 %2009  ;;  %v2877_v52 = vpop.permute.xlu0 %2004  ;;  %v270_v42 = vsel %vm3685_vm9, %v3684_v56, %v1971_v35  ;;  %v3688_v4 = vunpack.i.h.bf16 %v2702_v13  ;;  %v1004_v56 = vsel %vm906_vm12, %v991_v57, %v686_v23  ;;  %v1972_v28 = vunpack.i.h.bf16 %v2836_v32 }
  0xed   :  { %v2011_v2 = vunpack.i.l.bf16 %v2875_v37  ;;  %v322_v6 = vsel %vm318_vm13, %v3687_v31, %v1981_v15  ;;  %v910_v43 = vsel %vm906_vm12, %v896_v63, %v270_v42  ;;  %v1017_v1 = vsel %vm920_vm15, %v1004_v56, %v738_v54 }
  0xee   :  { %v374_v44 = vsel %vm3667_vm4, %v3688_v4, %v2001_v19  ;;  %v1967_v31 = vunpack.i.h.bf16 %v2838_v14  ;;  %v3690_v13 = vunpack.i.h.bf16 %v2774_v26  ;;  %v924_v57 = vsel %vm920_vm15, %v910_v43, %v322_v6 }
  0xef   :  { %v790_v25 = vsel %vm3668_vm2, %v1932_v47, %v2011_v2  ;;  %vm3691_vm1 = vcmask 1045504   ;;  %vm3693_vm10 = vcmask 572416   ;;  %v1977_v63 = vunpack.i.h.bf16 %v2845_v41 }
  0xf0   :  { %v2899_v46 = vpop.permute.xlu1 %2019  ;;  %v2901_v45 = vpop.permute.xlu0 %2014  ;;  %v1030_v4 = vsel %vm3691_vm1, %v1017_v1, %v790_v25  ;;  %vm3694_vm8 = vmmov %vm3691_vm1  ;;  %vm3695_vm9 = vcmask 1046528   ;;  %v1991_v6 = vunpack.i.l.bf16 %v2862_v40  ;;  %v1986_v25 = vunpack.i.l.bf16 %v2864_v48 }
  0xf1   :  { %v2016_v22 = vunpack.i.l.bf16 %v2901_v45  ;;  %v938_v14 = vsel %vm3694_vm8, %v924_v57, %v374_v44  ;;  %vm3697_vm1 = vmmov %vm3695_vm9  ;;  %vm3700_vm8 = vcmask 564224   ;;  %v1997_v57 = vunpack.i.h.bf16 %v2870_v62 }
  0xf2   :  { %v635_v44 = vsel %vm3700_vm8, %v1966_v61, %v1967_v31  ;;  %v480_v61 = vsel %vm474_vm6, %v1952_v29, %v1986_v25 }
  0xf3   :  { %v426_v47 = vsel %vm3665_vm0, %v3689_v9, %v2016_v22  ;;  %v583_v9 = vsel %vm3693_vm10, %v3692_v8, %v1962_v36  ;;  %vm3696_vm0 = vcmask 1040384   ;;  %vm3699_vm10 = vcmask 818176  }
  0xf4   :  { %v2943_v34 = vpop.permute.xlu1 %2029  ;;  %v2945_v20 = vpop.permute.xlu0 %2024  ;;  %v966_v56 = vsel %vm3696_vm0, %v479_v5, %v531_v53  ;;  %v952_v50 = vsel %vm3697_vm1, %v938_v14, %v426_v47  ;;  %v271_v41 = vsel %vm3699_vm10, %v1971_v35, %v1972_v28  ;;  %v687_v53 = vsel %vm682_vm11, %v1976_v49, %v1977_v63  ;;  %vm3706_vm10 = vmmov %vm3700_vm8 }
  0xf5   :  { %v2026_v11 = vunpack.i.l.bf16 %v2945_v20  ;;  %v2006_v47 = vunpack.i.l.bf16 %v2877_v52  ;;  %v2021_v49 = vunpack.i.l.bf16 %v2899_v46  ;;  %v2012_v14 = vunpack.i.h.bf16 %v2875_v37 }
  0xf6   :  { %vm3705_vm1 = vcmask 130048   ;;  %v2027_v62 = vunpack.i.h.bf16 %v2945_v20 }
  0xf7   :  { %v842_v23 = vsel %vm3666_vm3, %v3690_v13, %v2026_v11  ;;  %vm3698_vm3 = vcmask 1041408  }
  0xf8   :  { %v2982_v42 = vpop.permute.xlu1 %2039  ;;  %v2984_v54 = vpop.permute.xlu0 %2034  ;;  %v1043_v26 = vsel %vm3695_vm9, %v1030_v4, %v842_v23  ;;  %v883_v43 = vsel %vm3698_vm3, %v869_v39, %v167_v12  ;;  %v1982_v23 = vunpack.i.h.bf16 %v2843_v38  ;;  %vm3701_vm0 = vmmov %vm3698_vm3  ;;  %v3702_v4 = vpack.c.bf16 %v2803_v51, %v2809_v58 }
  0xf9   :  { %v1059_v1 = vpack.c.bf16 %v1043_v26, %v952_v50  ;;  %v897_v13 = vsel %vm892_vm5, %v883_v43, %v219_v24  ;;  %v979_v5 = vsel %vm3701_vm0, %v966_v56, %v583_v9  ;;  %v532_v24 = vsel %vm526_vm7, %v1957_v18, %v1991_v6  ;;  %vm3708_vm8 = vmmov %vm3701_vm0 }
  0xfa   :  { %v911_v35 = vsel %vm906_vm12, %v897_v13, %v271_v41  ;;  %v992_v8 = vsel %vm892_vm5, %v979_v5, %v635_v44  ;;  %v2002_v9 = vunpack.i.h.bf16 %v2868_v60  ;;  %v2036_v18 = vunpack.i.l.bf16 %v2984_v54 }
  0xfb   :  { %1167 = vmatprep.subr.bf16.mxu1 %v1059_v1  ;;  %v323_v27 = vsel %vm318_vm13, %v1981_v15, %v1982_v23  ;;  %v1005_v29 = vsel %vm906_vm12, %v992_v8, %v687_v53  ;;  %v2031_v26 = vunpack.i.l.bf16 %v2943_v34  ;;  %vm3703_vm3 = vcmask 1040384  }
  0xfc   :  { %v3003_v12 = vpop.permute.xlu1 %2049  ;;  %v3005_v39 = vpop.permute.xlu0 %2044  ;;  %1168 = vmatpush1.bf16.msra.mxu1 %v3702_v4  ;;  %v967_v51 = vsel %vm3703_vm3, %v480_v61, %v532_v24  ;;  %v739_v58 = vsel %vm734_vm14, %v1996_v33, %v1997_v57  ;;  %vm3704_vm9 = vcmask 572416   ;;  %v2041_v38 = vunpack.i.l.bf16 %v2982_v42 }
  0xfd   :  { %v2046_v56 = vunpack.i.l.bf16 %v3005_v39  ;;  %v584_v50 = vsel %vm3704_vm9, %v1962_v36, %v2006_v47  ;;  %v636_v41 = vsel %vm3706_vm10, %v1967_v31, %v2021_v49  ;;  %v2051_v33 = vunpack.i.l.bf16 %v3003_v12 }
  0xfe   :  { %v3707_v36 = vmov 0   ;;  %v375_v13 = vsel %vm3667_vm4, %v2001_v19, %v2002_v9  ;;  %v791_v44 = vsel %vm3668_vm2, %v2011_v2, %v2012_v14  ;;  %v688_v31 = vsel %vm682_vm11, %v1977_v63, %v2036_v18 }
  0xff   :  { %1659 = vmatmul.mubr.msk.bf16.vlgmr.msra.gmra.mxu1 %vm3705_vm1, %v2833_v30  ;;  %v980_v53 = vsel %vm3708_vm8, %v967_v51, %v584_v50  ;;  %v2017_v24 = vunpack.i.h.bf16 %v2901_v45  ;;  %vm3709_vm0 = vcmask 818176   ;;  %v740_v37 = vsel %vm734_vm14, %v1997_v57, %v2046_v56 }
 0x100   :  { %v3038_v43 = vpop.permute.xlu1 %2059  ;;  %v3040_v15 = vpop.permute.xlu0 %2054  ;;  %1195 = vmatprep.mubr.bf16.mxu1 %v3707_v36  ;;  %v272_v60 = vsel %vm3709_vm0, %v1972_v28, %v2031_v26  ;;  %v1018_v2 = vsel %vm920_vm15, %v1005_v29, %v739_v58  ;;  %v993_v19 = vsel %vm892_vm5, %v980_v53, %v636_v41  ;;  %v324_v63 = vsel %vm318_vm13, %v1982_v23, %v2041_v38 }
 0x101   :  { %v2056_v1 = vunpack.i.l.bf16 %v3040_v15  ;;  %v2061_v5 = vunpack.i.l.bf16 %v3038_v43  ;;  %vm3710_vm3 = vcmask 334848   ;;  %v1006_v57 = vsel %vm906_vm12, %v993_v19, %v688_v31 }
 0x102   :  { %v843_v28 = vsel %vm3710_vm3, %v2026_v11, %v2027_v62  ;;  %v376_v8 = vsel %vm3667_vm4, %v2002_v9, %v2051_v33  ;;  %vm3711_vm9 = vcmask 1045504   ;;  %v1019_v51 = vsel %vm920_vm15, %v1006_v57, %v740_v37  ;;  %vm3714_vm8 = vmmov %vm3710_vm3 }
 0x103   :  { %v792_v61 = vsel %vm3668_vm2, %v2012_v14, %v2056_v1  ;;  %v1031_v29 = vsel %vm3711_vm9, %v1018_v2, %v791_v44  ;;  %v912_v14 = vsel %vm906_vm12, %v2475_v59, %v272_v60  ;;  %vm3712_vm1 = vcmask 793600   ;;  %vm3715_vm0 = vmmov %vm3711_vm9 }
 0x104   :  { %v3079_v4 = vpop.permute.xlu1 %2069  ;;  %v3081_v32 = vpop.permute.xlu0 %2064  ;;  %v428_v20 = vsel %vm3712_vm1, %v2017_v24, %v2061_v5  ;;  %vm3713_vm10 = vmmov %vm3712_vm1  ;;  %v926_v58 = vsel %vm920_vm15, %v912_v14, %v324_v63  ;;  %v1032_v50 = vsel %vm3715_vm0, %v1019_v51, %v792_v61  ;;  %v925_v59 = vsel %vm920_vm15, %v911_v35, %v323_v27 }
 0x105   :  { %v2066_v23 = vunpack.i.l.bf16 %v3081_v32  ;;  %v427_v11 = vsel %vm3713_vm10, %v2016_v22, %v2017_v24  ;;  %vm3716_vm3 = vmmov %vm3715_vm0  ;;  %vm3717_vm9 = vcmask 1046528   ;;  %vm3719_vm10 = vcmask 130048  }
 0x106   :  { %v940_v31 = vsel %vm3716_vm3, %v926_v58, %v376_v8  ;;  %vm3718_vm1 = vmmov %vm3717_vm9  ;;  %v1987_v63 = vunpack.i.h.bf16 %v2864_v48  ;;  %v2007_v61 = vunpack.i.h.bf16 %v2877_v52  ;;  %v2022_v57 = vunpack.i.h.bf16 %v2899_v46 }
 0x107   :  { %v844_v9 = vsel %vm3714_vm8, %v2027_v62, %v2066_v23  ;;  %v1044_v22 = vsel %vm3718_vm1, %v1031_v29, %v843_v28  ;;  %1660 = vmatmul.mubr.msk.bf16.gmra.mxu1 %vm3719_vm10, %v2860_v0  ;;  %vm3720_vm4 = vmmov %vm3715_vm0  ;;  %v2032_v28 = vunpack.i.h.bf16 %v2943_v34  ;;  %v2042_v8 = vunpack.i.h.bf16 %v2982_v42 }
 0x108   :  { %v3107_v41 = vpop.permute.xlu1 %2079  ;;  %v3109_v44 = vpop.permute.xlu0 %2074  ;;  %v1045_v45 = vsel %vm3717_vm9, %v1032_v50, %v844_v9  ;;  %v939_v53 = vsel %vm3720_vm4, %v925_v59, %v375_v13  ;;  %vm3721_vm8 = vmmov %vm3718_vm1  ;;  %1287 = vmatprep.mubr.bf16.mxu1 %v3707_v36  ;;  %v1992_v13 = vunpack.i.h.bf16 %v2862_v40  ;;  %v2037_v29 = vunpack.i.h.bf16 %v2984_v54 }
 0x109   :  { %v954_v62 = vsel %vm3721_vm8, %v940_v31, %v428_v20  ;;  %vm3722_vm0 = vmmov %vm3718_vm1  ;;  %v2047_v58 = vunpack.i.h.bf16 %v3005_v39  ;;  %vm3724_vm3 = vcmask 572416   ;;  %vm3725_vm9 = vcmask 818176  }
 0x10a   :  { %v1061_v35 = vpack.c.bf16 %v1045_v45, %v954_v62  ;;  %v953_v27 = vsel %vm3722_vm0, %v939_v53, %v427_v11  ;;  %vm3723_vm4 = vmmov %vm3719_vm10  ;;  %v533_v20 = vsel %vm526_vm7, %v1991_v6, %v1992_v13  ;;  %v481_v11 = vsel %vm474_vm6, %v1986_v25, %v1987_v63 }
 0x10b   :  { %v1060_v24 = vpack.c.bf16 %v1044_v22, %v953_v27  ;;  %v585_v9 = vsel %vm3724_vm3, %v2006_v47, %v2007_v61  ;;  %v273_v50 = vsel %vm3725_vm9, %v2031_v26, %v2032_v28  ;;  %v2057_v40 = vunpack.i.h.bf16 %v3040_v15  ;;  %vm3728_vm8 = vmmov %vm3723_vm4 }
 0x10c   :  { %1218 = vmatprep.subr.bf16.mxu0 %v1061_v35  ;;  %v3120_v60 = vpop.permute.xlu1 %2089  ;;  %v3122_v37 = vpop.permute.xlu0 %2084  ;;  %vm3726_vm1 = vcmask 564224   ;;  %v325_v52 = vsel %vm318_vm13, %v2041_v38, %v2042_v8  ;;  %v2052_v6 = vunpack.i.h.bf16 %v3003_v12  ;;  %v2067_v25 = vunpack.i.h.bf16 %v3081_v32 }
 0x10d   :  { %1219 = vmatpush1.bf16.msra.mxu0 %v1060_v24  ;;  %v637_v48 = vsel %vm3726_vm1, %v2021_v49, %v2022_v57  ;;  %vm3727_vm10 = vcmask 1040384   ;;  %v689_v26 = vsel %vm682_vm11, %v2036_v18, %v2037_v29  ;;  %v2062_v46 = vunpack.i.h.bf16 %v3038_v43 }
 0x10e   :  { %v968_v47 = vsel %vm3727_vm10, %v481_v11, %v533_v20  ;;  %v2076_v49 = vunpack.i.l.bf16 %v3109_v44  ;;  %vm3729_vm0 = vcmask 1041408   ;;  %v913_v45 = vsel %vm906_vm12, %v2462_v55, %v273_v50 }
 0x10f   :  { %v981_v38 = vsel %vm3729_vm0, %v968_v47, %v585_v9  ;;  %v741_v54 = vsel %vm734_vm14, %v2046_v56, %v2047_v58  ;;  %v927_v22 = vsel %vm920_vm15, %v913_v45, %v325_v52  ;;  %v793_v53 = vsel %vm3668_vm2, %v2056_v1, %v2057_v40 }
 0x110   :  { %v3124_v2 = vpop.permute.xlu1 %2099  ;;  %v3126_v19 = vpop.permute.xlu0 %2094  ;;  %1661 = vmatmul.mubr.msk.bf16.vlgmr.msra.gmra.mxu0 %vm3723_vm4, %v2833_v30  ;;  %v994_v18 = vsel %vm892_vm5, %v981_v38, %v637_v48  ;;  %v2071_v55 = vunpack.i.l.bf16 %v3079_v4  ;;  %vm3730_vm4 = vcmask 801792   ;;  %vm3731_vm3 = vcmask 334848  }
 0x111   :  { %1246 = vmatprep.mubr.bf16.mxu0 %v3707_v36  ;;  %v1007_v62 = vsel %vm906_vm12, %v994_v18, %v689_v26  ;;  %v377_v56 = vsel %vm3730_vm4, %v2051_v33, %v2052_v6  ;;  %v845_v35 = vsel %vm3731_vm3, %v2066_v23, %v2067_v25  ;;  %v2081_v27 = vunpack.i.l.bf16 %v3107_v41 }
 0x112   :  { %v1020_v1 = vsel %vm920_vm15, %v1007_v62, %v741_v54  ;;  %vm3732_vm9 = vcmask 793600   ;;  %v534_v20 = vsel %vm526_vm7, %v1992_v13, %v2076_v49  ;;  %v2086_v33 = vunpack.i.l.bf16 %v3122_v37 }
 0x113   :  { %v429_v24 = vsel %vm3732_vm9, %v2061_v5, %v2062_v46  ;;  %vm3733_vm1 = vcmask 1045504   ;;  %v2072_v50 = vunpack.i.h.bf16 %v3079_v4  ;;  %v2077_v48 = vunpack.i.h.bf16 %v3109_v44 }
 0x114   :  { %v3138_v14 = vpop.permute.xlu1 %2109  ;;  %v3140_v51 = vpop.permute.xlu0 %2104  ;;  %v1033_v23 = vsel %vm3733_vm1, %v1020_v1, %v793_v53  ;;  %v2096_v52 = vunpack.i.l.bf16 %v3126_v19  ;;  %vm3734_vm10 = vmmov %vm3733_vm1  ;;  %v482_v5 = vsel %vm474_vm6, %v1987_v63, %v2071_v55  ;;  %v2082_v13 = vunpack.i.h.bf16 %v3107_v41 }
 0x115   :  { %v941_v47 = vsel %vm3734_vm10, %v927_v22, %v377_v56  ;;  %vm3736_vm0 = vcmask 572416   ;;  %vm3737_vm4 = vcmask 1040384   ;;  %v2091_v54 = vunpack.i.l.bf16 %v3120_v60 }
 0x116   :  { %v586_v38 = vsel %vm3736_vm0, %v2007_v61, %v2081_v27  ;;  %v969_v45 = vsel %vm3737_vm4, %v482_v5, %v534_v20  ;;  %vm3738_vm3 = vcmask 564224   ;;  %v2101_v18 = vunpack.i.l.bf16 %v3124_v2  ;;  %vm3740_vm1 = vmmov %vm3736_vm0 }
 0x117   :  { %v638_v44 = vsel %vm3738_vm3, %v2022_v57, %v2086_v33  ;;  %v483_v61 = vsel %vm474_vm6, %v2071_v55, %v2072_v50  ;;  %v535_v56 = vsel %vm526_vm7, %v2076_v49, %v2077_v48  ;;  %v587_v1 = vsel %vm3740_vm1, %v2081_v27, %v2082_v13  ;;  %vm3743_vm0 = vmmov %vm3737_vm4 }
 0x118   :  { %v3174_v59 = vpop.permute.xlu1 %2119  ;;  %v3176_v31 = vpop.permute.xlu0 %2114  ;;  %1662 = vmatmul.mubr.msk.bf16.gmra.mxu0 %vm3728_vm8, %v2860_v0  ;;  %vm3735_vm8 = vcmask 1046528   ;;  %vm3741_vm10 = vcmask 1041408   ;;  %v2087_v55 = vunpack.i.h.bf16 %v3122_v37  ;;  %v326_v34 = vsel %vm318_vm13, %v2042_v8, %v2101_v18 }
 0x119   :  { %1338 = vmatprep.mubr.bf16.mxu0 %v3707_v36  ;;  %v3229_v26 = vsel %vm3735_vm8, %v1033_v23, %v845_v35  ;;  %v2116_v4 = vunpack.i.l.bf16 %v3176_v31  ;;  %vm3739_vm9 = vmmov %vm3735_vm8  ;;  %v690_v35 = vsel %vm682_vm11, %v2037_v29, %v2096_v52  ;;  %v2121_v57 = vunpack.i.l.bf16 %v3174_v59 }
 0x11a   :  { %v955_v62 = vsel %vm3739_vm9, %v941_v47, %v429_v24  ;;  %v982_v20 = vsel %vm3741_vm10, %v969_v45, %v586_v38  ;;  %vm3742_vm8 = vcmask 818176   ;;  %v970_v47 = vsel %vm3743_vm0, %v483_v61, %v535_v56 }
 0x11b   :  { %v1062_v24 = vpack.c.bf16 %v3229_v26, %v955_v62  ;;  %v274_v49 = vsel %vm3742_vm8, %v2032_v28, %v2091_v54  ;;  %v995_v29 = vsel %vm892_vm5, %v982_v20, %v638_v44  ;;  %v742_v27 = vsel %vm734_vm14, %v2047_v58, %v2116_v4 }
 0x11c   :  { %v3217_v11 = vpop.permute.xlu1 %2129  ;;  %v3219_v9 = vpop.permute.xlu0 %2124  ;;  %v1008_v28 = vsel %vm906_vm12, %v995_v29, %v690_v35  ;;  %v2111_v58 = vunpack.i.l.bf16 %v3138_v14  ;;  %v2106_v26 = vunpack.i.l.bf16 %v3140_v51  ;;  %vm3744_vm4 = vcmask 801792  }
 0x11d   :  { %v2131_v22 = vunpack.i.l.bf16 %v3217_v11  ;;  %v378_v42 = vsel %vm3744_vm4, %v2052_v6, %v2121_v57  ;;  %v2092_v15 = vunpack.i.h.bf16 %v3120_v60  ;;  %v1021_v38 = vsel %vm920_vm15, %v1008_v28, %v742_v27 }
 0x11e   :  { %vm3745_vm3 = vcmask 793600   ;;  %vm3746_vm9 = vcmask 564224   ;;  %vm3747_vm1 = vcmask 334848   ;;  %vm3748_vm10 = vcmask 1045504  }
 0x11f   :  { %v794_v37 = vsel %vm3668_vm2, %v2057_v40, %v2131_v22  ;;  %v914_v40 = vsel %vm906_vm12, %v2495_v16, %v274_v49  ;;  %v639_v44 = vsel %vm3746_vm9, %v2086_v33, %v2087_v55  ;;  %v2097_v16 = vunpack.i.h.bf16 %v3126_v19  ;;  %vm3749_vm8 = vmmov %vm3748_vm10 }
 0x120   :  { %v3238_v63 = vpop.permute.xlu1 %2139  ;;  %v3240_v53 = vpop.permute.xlu0 %2134  ;;  %v928_v12 = vsel %vm920_vm15, %v914_v40, %v326_v34  ;;  %v1034_v60 = vsel %vm3748_vm10, %v1021_v38, %v794_v37  ;;  %v2126_v62 = vunpack.i.l.bf16 %v3219_v9  ;;  %vm3750_vm0 = vcmask 1046528  }
 0x121   :  { %v2136_v23 = vunpack.i.l.bf16 %v3240_v53  ;;  %v942_v43 = vsel %vm3749_vm8, %v928_v12, %v378_v42  ;;  %v536_v32 = vsel %vm526_vm7, %v2077_v48, %v2111_v58  ;;  %v2141_v33 = vunpack.i.l.bf16 %v3238_v63  ;;  %vm3751_vm4 = vmmov %vm3750_vm0 }
 0x122   :  { %vm3753_vm9 = vcmask 818176   ;;  %v2102_v48 = vunpack.i.h.bf16 %v3124_v2  ;;  %vm3755_vm10 = vcmask 572416   ;;  %v2132_v38 = vunpack.i.h.bf16 %v3217_v11 }
 0x123   :  { %v430_v45 = vsel %vm3745_vm3, %v2062_v46, %v2136_v23  ;;  %vm3752_vm3 = vcmask 1041408   ;;  %v275_v34 = vsel %vm3753_vm9, %v2091_v54, %v2092_v15  ;;  %v588_v54 = vsel %vm3755_vm10, %v2082_v13, %v2126_v62 }
 0x124   :  { %v3277_v5 = vpop.permute.xlu1 %2149  ;;  %v3279_v39 = vpop.permute.xlu0 %2144  ;;  %v956_v35 = vsel %vm3751_vm4, %v942_v43, %v430_v45  ;;  %v983_v20 = vsel %vm3752_vm3, %v970_v47, %v587_v1  ;;  %v2117_v1 = vunpack.i.h.bf16 %v3176_v31  ;;  %vm3756_vm8 = vcmask 564224   ;;  %vm3758_vm4 = vmmov %vm3752_vm3 }
 0x125   :  { %v2146_v8 = vunpack.i.l.bf16 %v3279_v39  ;;  %v2151_v49 = vunpack.i.l.bf16 %v3277_v5  ;;  %v996_v28 = vsel %vm892_vm5, %v983_v20, %v639_v44  ;;  %v640_v19 = vsel %vm3756_vm8, %v2087_v55, %v2141_v33 }
 0x126   :  { %v2122_v41 = vunpack.i.h.bf16 %v3174_v59  ;;  %v2147_v44 = vunpack.i.h.bf16 %v3279_v39  ;;  %v327_v55 = vsel %vm318_vm13, %v2101_v18, %v2102_v48  ;;  %v743_v39 = vsel %vm734_vm14, %v2116_v4, %v2117_v1 }
 0x127   :  { %v846_v6 = vsel %vm3747_vm1, %v2067_v25, %v2146_v8  ;;  %v484_v25 = vsel %vm474_vm6, %v2072_v50, %v2106_v26  ;;  %v691_v50 = vsel %vm682_vm11, %v2096_v52, %v2097_v16  ;;  %vm3754_vm1 = vcmask 1040384  }
 0x128   :  { %v3306_v61 = vpop.permute.xlu1 %2159  ;;  %v3308_v56 = vpop.permute.xlu0 %2154  ;;  %v1047_v46 = vsel %vm3750_vm0, %v1034_v60, %v846_v6  ;;  %v971_v42 = vsel %vm3754_vm1, %v484_v25, %v536_v32  ;;  %vm3757_vm0 = vmmov %vm3753_vm9  ;;  %v2137_v2 = vunpack.i.h.bf16 %v3240_v53  ;;  %vm3759_vm3 = vcmask 801792  }
 0x129   :  { %v2156_v29 = vunpack.i.l.bf16 %v3308_v56  ;;  %v1063_v27 = vpack.c.bf16 %v1047_v46, %v956_v35  ;;  %v2161_v37 = vunpack.i.l.bf16 %v3306_v61  ;;  %v276_v13 = vsel %vm3757_vm0, %v2092_v15, %v2151_v49  ;;  %vm3762_vm10 = vmmov %vm3759_vm3 }
 0x12a   :  { %v984_v6 = vsel %vm3758_vm4, %v971_v42, %v588_v54  ;;  %vm3760_vm9 = vcmask 130048   ;;  %v1009_v46 = vsel %vm906_vm12, %v996_v28, %v691_v50  ;;  %v795_v31 = vsel %vm3668_vm2, %v2131_v22, %v2132_v38 }
 0x12b   :  { %1269 = vmatprep.subr.bf16.mxu1 %v1063_v27  ;;  %v692_v12 = vsel %vm682_vm11, %v2097_v16, %v2156_v29  ;;  %v997_v60 = vsel %vm892_vm5, %v984_v6, %v640_v19  ;;  %v916_v4 = vsel %vm906_vm12, %v2502_v17, %v276_v13  ;;  %vm3761_vm1 = vcmask 334848  }
 0x12c   :  { %v3337_v47 = vpop.permute.xlu1 %2169  ;;  %v3339_v40 = vpop.permute.xlu0 %2164  ;;  %1270 = vmatpush1.bf16.msra.mxu1 %v1062_v24  ;;  %v328_v24 = vsel %vm318_vm13, %v2102_v48, %v2161_v37  ;;  %v1010_v32 = vsel %vm906_vm12, %v997_v60, %v692_v12  ;;  %v847_v25 = vsel %vm3761_vm1, %v2146_v8, %v2147_v44  ;;  %v379_v11 = vsel %vm3762_vm10, %v2121_v57, %v2122_v41 }
 0x12d   :  { %v2171_v52 = vunpack.i.l.bf16 %v3337_v47  ;;  %v2166_v45 = vunpack.i.l.bf16 %v3339_v40  ;;  %v930_v35 = vsel %vm920_vm15, %v916_v4, %v328_v24  ;;  %v1022_v22 = vsel %vm920_vm15, %v1009_v46, %v743_v39 }
 0x12e   :  { %vm3763_vm8 = vcmask 793600   ;;  %vm3764_vm0 = vcmask 1045504   ;;  %v915_v8 = vsel %vm906_vm12, %v2499_v3, %v275_v34  ;;  %vm3768_vm10 = vcmask 1046528  }
 0x12f   :  { %v744_v15 = vsel %vm734_vm14, %v2117_v1, %v2166_v45  ;;  %v380_v18 = vsel %vm3759_vm3, %v2122_v41, %v2171_v52  ;;  %1663 = vmatmul.mubr.msk.bf16.vlgmr.msra.gmra.mxu1 %vm3760_vm9, %v2833_v30  ;;  %vm3765_vm4 = vmmov %vm3764_vm0  ;;  %v929_v57 = vsel %vm920_vm15, %v915_v8, %v327_v55  ;;  %v2107_v55 = vunpack.i.h.bf16 %v3140_v51 }
 0x130   :  { %v3373_v16 = vpop.permute.xlu1 %416  ;;  %v3375_v43 = vpop.permute.xlu0 %780  ;;  %1297 = vmatprep.mubr.bf16.mxu1 %v3707_v36  ;;  %v1023_v27 = vsel %vm920_vm15, %v1010_v32, %v744_v15  ;;  %v944_v28 = vsel %vm3764_vm0, %v930_v35, %v380_v18  ;;  %v1035_v48 = vsel %vm3765_vm4, %v1022_v22, %v795_v31  ;;  %vm3766_vm3 = vmmov %vm3763_vm8  ;;  %v2127_v6 = vunpack.i.h.bf16 %v3219_v9 }
 0x131   :  { %v796_v20 = vsel %vm3668_vm2, %v2132_v38, %v3375_v43  ;;  %v432_v17 = vsel %vm3763_vm8, %v2137_v2, %v3373_v16  ;;  %v431_v50 = vsel %vm3766_vm3, %v2136_v23, %v2137_v2  ;;  %vm3767_vm9 = vmmov %vm3764_vm0  ;;  %v1048_v38 = vsel %vm3768_vm10, %v1035_v48, %v847_v25 }
 0x132   :  { %v1036_v1 = vsel %vm3767_vm9, %v1023_v27, %v796_v20  ;;  %vm3769_vm8 = vmmov %vm3764_vm0  ;;  %vm3773_vm2 = vcmask 130048   ;;  %v2142_v39 = vunpack.i.h.bf16 %v3238_v63  ;;  %v2152_v60 = vunpack.i.h.bf16 %v3277_v5 }
 0x133   :  { %v943_v3 = vsel %vm3769_vm8, %v929_v57, %v379_v11  ;;  %vm3770_vm0 = vmmov %vm3768_vm10  ;;  %v485_v18 = vsel %vm474_vm6, %v2106_v26, %v2107_v55  ;;  %v2162_v46 = vunpack.i.h.bf16 %v3306_v61  ;;  %v2157_v31 = vunpack.i.h.bf16 %v3308_v56 }
 0x134   :  { %v473_v42 = vpop.permute.xlu1 %472  ;;  %v3405_v59 = vpop.permute.xlu0 %832  ;;  %v958_v34 = vsel %vm3770_vm0, %v944_v28, %v432_v17  ;;  %vm3771_vm4 = vmmov %vm3770_vm0  ;;  %v2172_v32 = vunpack.i.h.bf16 %v3337_v47  ;;  %vm3777_vm10 = vcmask 564224   ;;  %vm3778_vm8 = vcmask 818176  }
 0x135   :  { %v848_v54 = vsel %vm3761_vm1, %v2147_v44, %v3405_v59  ;;  %vm3772_vm3 = vmmov %vm3770_vm0  ;;  %v2112_v44 = vunpack.i.h.bf16 %v3138_v14  ;;  %v2167_v14 = vunpack.i.h.bf16 %v3339_v40  ;;  %vm3776_vm1 = vcmask 1040384  }
 0x136   :  { %v1049_v53 = vsel %vm3771_vm4, %v1036_v1, %v848_v54  ;;  %v957_v23 = vsel %vm3772_vm3, %v943_v3, %v431_v50  ;;  %vm3774_vm9 = vmmov %vm3773_vm2  ;;  %v641_v26 = vsel %vm3777_vm10, %v2141_v33, %v2142_v39  ;;  %v277_v35 = vsel %vm3778_vm8, %v2151_v49, %v2152_v60 }
 0x137   :  { %v1065_v19 = vpack.c.bf16 %v1049_v53, %v958_v34  ;;  %v1064_v12 = vpack.c.bf16 %v1048_v38, %v957_v23  ;;  %1664 = vmatmul.mubr.msk.bf16.gmra.mxu1 %vm3773_vm2, %v2860_v0  ;;  %v537_v2 = vsel %vm526_vm7, %v2111_v58, %v2112_v44  ;;  %vm3775_vm2 = vcmask 572416  }
 0x138   :  { %v577_v41 = vpop.permute.xlu1 %576  ;;  %v525_v13 = vpop.permute.xlu0 %524  ;;  %1389 = vmatprep.mubr.bf16.mxu1 %v3707_v36  ;;  %v589_v4 = vsel %vm3775_vm2, %v2126_v62, %v2127_v6  ;;  %v972_v51 = vsel %vm3776_vm1, %v485_v18, %v537_v2  ;;  %vm3779_vm0 = vcmask 1041408   ;;  %v329_v20 = vsel %vm318_vm13, %v2161_v37, %v2162_v46  ;;  %vm3782_vm3 = vmmov %vm3775_vm2 }
 0x139   :  { %1320 = vmatprep.subr.bf16.mxu0 %v1065_v19  ;;  %v538_v9 = vsel %vm526_vm7, %v2112_v44, %v525_v13  ;;  %v985_v62 = vsel %vm3779_vm0, %v972_v51, %v589_v4  ;;  %v693_v27 = vsel %vm682_vm11, %v2156_v29, %v2157_v31  ;;  %vm3780_vm4 = vcmask 801792   ;;  %vm3781_vm7 = vmmov %vm3776_vm1 }
 0x13a   :  { %1321 = vmatpush1.bf16.msra.mxu0 %v1064_v12  ;;  %v381_v63 = vsel %vm3780_vm4, %v2171_v52, %v2172_v32  ;;  %v745_v5 = vsel %vm734_vm14, %v2166_v45, %v2167_v14  ;;  %v486_v33 = vsel %vm474_vm6, %v2107_v55, %v473_v42  ;;  %v974_v49 = vsel %vm3781_vm7, %v473_v42, %v525_v13  ;;  %vm3784_vm2 = vmmov %vm3778_vm8 }
 0x13b   :  { %v998_v61 = vsel %vm892_vm5, %v985_v62, %v641_v26  ;;  %v917_v37 = vsel %vm906_vm12, %v2492_v10, %v277_v35  ;;  %v590_v56 = vsel %vm3782_vm3, %v2127_v6, %v577_v41  ;;  %vm3785_vm6 = vcmask 130048   ;;  %vm3787_vm10 = vmmov %vm3779_vm0 }
 0x13c   :  { %v265_v24 = vpop.permute.xlu1 %264  ;;  %v629_v15 = vpop.permute.xlu0 %628  ;;  %v931_v52 = vsel %vm920_vm15, %v917_v37, %v329_v20  ;;  %v1011_v40 = vsel %vm906_vm12, %v998_v61, %v693_v27  ;;  %v987_v10 = vsel %vm3787_vm10, %v974_v49, %v577_v41  ;;  %vm3788_vm8 = vmmov %vm3785_vm6  ;;  %vm3789_vm0 = vcmask 564224  }
 0x13d   :  { %1665 = vmatmul.mubr.msk.bf16.vlgmr.msra.gmra.mxu0 %vm3774_vm9, %v2833_v30  ;;  %vm3783_vm9 = vmmov %vm3776_vm1  ;;  %v278_v45 = vsel %vm3784_vm2, %v2152_v60, %v265_v24  ;;  %vm3786_vm1 = vcmask 1045504   ;;  %v1024_v17 = vsel %vm920_vm15, %v1011_v40, %v745_v5  ;;  %v919_v28 = vsel %vm906_vm12, %v2506_v21, %v265_v24 }
 0x13e   :  { %1348 = vmatprep.mubr.bf16.mxu0 %v3707_v36  ;;  %v973_v29 = vsel %vm3783_vm9, %v486_v33, %v538_v9  ;;  %v945_v22 = vsel %vm3786_vm1, %v931_v52, %v381_v63  ;;  %v642_v8 = vsel %vm3789_vm0, %v2142_v39, %v629_v15  ;;  %vm3790_vm4 = vmmov %vm3787_vm10  ;;  %v1000_v50 = vsel %vm892_vm5, %v987_v10, %v629_v15 }
 0x13f   :  { %v986_v48 = vsel %vm3790_vm4, %v973_v29, %v590_v56  ;;  %v918_v42 = vsel %vm906_vm12, %v2513_v7, %v278_v45  ;;  %vm3791_vm7 = vcmask 801792   ;;  %vm3794_vm3 = vmmov %vm3786_vm1  ;;  %vm3802_vm10 = vcmask 334848  }
 0x140   :  { %v317_v25 = vpop.permute.xlu1 %316  ;;  %v681_v58 = vpop.permute.xlu0 %680  ;;  %v999_v23 = vsel %vm892_vm5, %v986_v48, %v642_v8  ;;  %vm3795_vm9 = vmmov %vm3786_vm1 }
 0x141   :  { %v330_v57 = vsel %vm318_vm13, %v2162_v46, %v317_v25  ;;  %v694_v1 = vsel %vm682_vm11, %v2157_v31, %v681_v58  ;;  %v933_v41 = vsel %vm920_vm15, %v919_v28, %v317_v25  ;;  %v1013_v13 = vsel %vm906_vm12, %v1000_v50, %v681_v58  ;;  %vm3799_vm2 = vmmov %vm3786_vm1 }
 0x142   :  { %v932_v12 = vsel %vm920_vm15, %v918_v42, %v330_v57  ;;  %v1012_v44 = vsel %vm906_vm12, %v999_v23, %v694_v1  ;;  %vm3792_vm11 = vcmask 793600   ;;  %vm3793_vm13 = vcmask 343040   ;;  %vm3798_vm12 = vmmov %vm3786_vm1 }
 0x143   :  { %vm3796_vm5 = vmmov %vm3793_vm13 }
 0x144   :  { %v369_v47 = vpop.permute.xlu1 %368  ;;  %v733_v11 = vpop.permute.xlu0 %732 }
 0x145   :  { %1666 = vmatmul.mubr.msk.bf16.gmra.mxu0 %vm3785_vm6, %v2860_v0  ;;  %v382_v54 = vsel %vm3791_vm7, %v2172_v32, %v369_v47  ;;  %v746_v7 = vsel %vm734_vm14, %v2167_v14, %v733_v11  ;;  %v947_v15 = vsel %vm3795_vm9, %v933_v41, %v369_v47  ;;  %v1026_v39 = vsel %vm920_vm15, %v1013_v13, %v733_v11  ;;  %vm3797_vm14 = vmmov %vm3792_vm11 }
 0x146   :  { %1718 = vmatprep.mubr.msk.bf16.mxu0 %vm3788_vm8, %v2833_v30  ;;  %v946_v24 = vsel %vm3794_vm3, %v932_v12, %v382_v54  ;;  %v1025_v18 = vsel %vm920_vm15, %v1012_v44, %v746_v7  ;;  %vm3800_vm6 = vcmask 1046528   ;;  %vm3803_vm8 = vmmov %vm3802_vm10 }
 0x147   :  { %vm3801_vm1 = vmmov %vm3800_vm6 }
 0x148   :  { %v2180_v38 = vpop.permute.xlu1 %2179  ;;  %v2175_v3 = vpop.permute.xlu0 %2174  ;;  %vm3804_vm0 = vmmov %vm3801_vm1 }
 0x149   :  { %v2182_v34 = vunpack.i.h.bf16 %v2180_v38  ;;  %v2181_v53 = vunpack.i.l.bf16 %v2180_v38  ;;  %v2177_v21 = vunpack.i.h.bf16 %v2175_v3  ;;  %v2176_v19 = vunpack.i.l.bf16 %v2175_v3  ;;  %vm3805_vm15 = vmmov %vm3799_vm2 }
 0x14a   :  { %vm3806_vm4 = vmmov %vm3804_vm0 }
 0x14b   :  { %v434_v55 = vsel %vm3792_vm11, %v2181_v53, %v2182_v34  ;;  %v797_v6 = vsel %vm3793_vm13, %v3375_v43, %v2176_v19  ;;  %v798_v60 = vsel %vm3796_vm5, %v2176_v19, %v2177_v21  ;;  %v433_v46 = vsel %vm3797_vm14, %v3373_v16, %v2181_v53  ;;  %vm3807_vm7 = vmmov %vm3804_vm0 }
 0x14c   :  { %v2185_v2 = vpop.permute.xlu0 %2184  ;;  %v1039_v32 = vsel %vm3798_vm12, %v1026_v39, %v2177_v21  ;;  %v1037_v43 = vsel %vm3799_vm2, %v1024_v17, %v797_v6  ;;  %v961_v14 = vsel %vm3800_vm6, %v947_v15, %v2182_v34  ;;  %v960_v25 = vsel %vm3801_vm1, %v946_v24, %v434_v55  ;;  %vm3808_vm11 = vmmov %vm3804_vm0 }
 0x14d   :  { %v2187_v31 = vunpack.i.h.bf16 %v2185_v2  ;;  %v2186_v4 = vunpack.i.l.bf16 %v2185_v2  ;;  %v1038_v35 = vsel %vm3805_vm15, %v1025_v18, %v798_v60  ;;  %v959_v62 = vsel %vm3807_vm7, %v945_v22, %v433_v46 }
 0x14e   :  { %vm3809_vm13 = vcmask 130048   ;;  %vm1649_vm5 = vcmask 254976   ;;  %vm1634_vm14 = vcmask 257024  }
 0x14f   :  { %v849_v58 = vsel %vm3802_vm10, %v3405_v59, %v2186_v4  ;;  %v850_v51 = vsel %vm3803_vm8, %v2186_v4, %v2187_v31  ;;  %v1052_v26 = vsel %vm3804_vm0, %v1039_v32, %v2187_v31  ;;  %vm3810_vm3 = vmmov %vm3809_vm13 }
 0x150   :  { %v1068_v16 = vpack.c.bf16 %v1052_v26, %v961_v14  ;;  %v1051_v9 = vsel %vm3806_vm4, %v1038_v35, %v850_v51  ;;  %v1050_v20 = vsel %vm3808_vm11, %v1037_v43, %v849_v58  ;;  %vm3811_vm9 = vmmov %vm3810_vm3 }
 0x151   :  { %v1067_v27 = vpack.c.bf16 %v1051_v9, %v960_v25  ;;  %v1066_v63 = vpack.c.bf16 %v1050_v20, %v959_v62 }
 0x152   :  { %1716 = vmatprep.subr.bf16.mxu0 %v1068_v16 }
 0x153   :  { %1371 = vmatprep.subr.bf16.mxu1 %v1067_v27  ;;  %1717 = vmatpush3.bf16.msra.mxu0 %v1068_v16 }
 0x154   :  { %1372 = vmatpush1.bf16.msra.mxu1 %v1066_v63 }
 0x156   :  { %1719 = vmatmul.mubr.msk.bf16.vlgmr.msra.gmra.mxu0 %vm3809_vm13, %v2860_v0 }
 0x157   :  { %1667 = vmatmul.mubr.msk.bf16.vlgmr.msra.gmra.mxu1 %vm3810_vm3, %v2833_v30  ;;  %v3523_v59 = vpop.permute.xlu1 %1074 }
 0x158   :  { %1399 = vmatprep.mubr.bf16.mxu1 %v3707_v36 }
 0x159   :  { %v3526_v61 = vpop.permute.xlu0 %1079 }
 0x15b   :  { %v3530_v36 = vpop.permute.xlu1 %1084 }
 0x15f   :  { %1668 = vmatmul.mubr.msk.bf16.gmra.mxu1 %vm3811_vm9, %v2860_v0 }
 0x19e   :  { %v1136_v5 = vpop.f32.mrf.mxu0 }
 0x19f   :  { %v1137_v33 = vadd.f32 %v1136_v5, %v3523_v59 }
 0x1a0   :  { %v1138_v49 = vpop.f32.mrf.mxu0 }
 0x1a1   :  { %v1139_v37 = vadd.f32 %v1138_v49, %v3523_v59  ;;  %v1456_v56 = vmax.f32 %v1137_v33, 0.0 }
 0x1a2   :  { %v1140_v29 = vpop.f32.mrf.mxu0 }
 0x1a3   :  { %v1457_v47 = vmax.f32 %v1139_v37, 0.0  ;;  %v1141_v30 = vadd.f32 %v1140_v29, %v3526_v61 }
 0x1a4   :  { %v1142_v11 = vpop.f32.mrf.mxu0 }
 0x1a5   :  { %v1692_v52 = vpack.c.bf16 %v1457_v47, %v1456_v56  ;;  %v1143_v0 = vadd.f32 %v1142_v11, %v3526_v61  ;;  %v1469_v40 = vmax.f32 %v1141_v30, 0.0 }
 0x1a6   :  { %v1146_v45 = vpop.f32.mrf.mxu0 }
 0x1a7   :  { %1628 = vst [vmem:[%s3636_s3] sm:$0xff] %v1692_v52  ;;  %v1470_v22 = vmax.f32 %v1143_v0, 0.0  ;;  %v1147_v17 = vadd.f32 %v1146_v45, %v3530_v36 }
 0x1a8   :  { %v1148_v10 = vpop.f32.mrf.mxu0 }
 0x1a9   :  { %v1699_v28 = vpack.c.bf16 %v1470_v22, %v1469_v40  ;;  %v1149_v8 = vadd.f32 %v1148_v10, %v3530_v36  ;;  %v1482_v48 = vmax.f32 %v1147_v17, 0.0 }
 0x1aa   :  { %v1150_v50 = vpop.f32.mrf.mxu0 }
 0x1ab   :  { %1636 = vst [vmem:[%s3636_s3 + $0x34] sm:$0xff] %v1699_v28  ;;  %v1483_v42 = vmax.f32 %v1149_v8, 0.0 }
 0x1ac   :  { %v1151_v57 = vpop.f32.mrf.mxu0 }
 0x1ad   :  { %v1706_v1 = vpack.c.bf16 %v1483_v42, %v1482_v48 }
 0x1af   :  { %1643 = vst [vmem:[%s3636_s3 + $0x68] sm:$0x33] %v1706_v1 }
 0x1bf   :  { %v1187_v54 = vpop.f32.mrf.mxu1 }
 0x1c0   :  { %v1188_v38 = vadd.f32 %v1187_v54, %v3523_v59 }
 0x1c1   :  { %v1189_v3 = vpop.f32.mrf.mxu1 }
 0x1c2   :  { %v1458_v34 = vmax.f32 %v1188_v38, 0.0  ;;  %v1190_v53 = vadd.f32 %v1189_v3, %v3523_v59 }
 0x1c3   :  { %v1191_v21 = vpop.f32.mrf.mxu1 }
 0x1c4   :  { %v1459_v19 = vmax.f32 %v1190_v53, 0.0  ;;  %v1192_v23 = vadd.f32 %v1191_v21, %v3526_v61 }
 0x1c5   :  { %v1193_v41 = vpop.f32.mrf.mxu1 }
 0x1c6   :  { %v1693_v13 = vpack.c.bf16 %v1459_v19, %v1458_v34  ;;  %v1471_v7 = vmax.f32 %v1192_v23, 0.0  ;;  %v1194_v12 = vadd.f32 %v1193_v41, %v3526_v61 }
 0x1c7   :  { %v1197_v44 = vpop.f32.mrf.mxu1 }
 0x1c8   :  { %1629 = vst [vmem:[%s3636_s3 + $0x8] sm:$0xff] %v1693_v13  ;;  %v1472_v55 = vmax.f32 %v1194_v12, 0.0  ;;  %v1198_v6 = vadd.f32 %v1197_v44, %v3530_v36 }
 0x1c9   :  { %v1199_v24 = vpop.f32.mrf.mxu1 }
 0x1ca   :  { %v1700_v15 = vpack.c.bf16 %v1472_v55, %v1471_v7  ;;  %v1484_v39 = vmax.f32 %v1198_v6, 0.0  ;;  %v1200_v60 = vadd.f32 %v1199_v24, %v3530_v36 }
 0x1cb   :  { %v1201_v2 = vpop.f32.mrf.mxu1 }
 0x1cc   :  { %1637 = vst [vmem:[%s3636_s3 + $0x3c] sm:$0xff] %v1700_v15  ;;  %v1485_v18 = vmax.f32 %v1200_v60, 0.0 }
 0x1cd   :  { %v1202_v46 = vpop.f32.mrf.mxu1 }
 0x1ce   :  { %v1707_v31 = vpack.c.bf16 %v1485_v18, %v1484_v39 }
 0x1d0   :  { %v1238_v4 = vpop.f32.mrf.mxu0  ;;  %1644 = vst [vmem:[%s3636_s3 + $0x70] sm:$0x33] %v1707_v31 }
 0x1d1   :  { %v1239_v32 = vadd.f32 %v1238_v4, %v3523_v59 }
 0x1d2   :  { %v1240_v43 = vpop.f32.mrf.mxu0 }
 0x1d3   :  { %v1460_v14 = vmax.f32 %v1239_v32, 0.0  ;;  %v1241_v25 = vadd.f32 %v1240_v43, %v3523_v59 }
 0x1d4   :  { %v1242_v58 = vpop.f32.mrf.mxu0 }
 0x1d5   :  { %v1461_v51 = vmax.f32 %v1241_v25, 0.0  ;;  %v1243_v26 = vadd.f32 %v1242_v58, %v3526_v61 }
 0x1d6   :  { %v1244_v35 = vpop.f32.mrf.mxu0 }
 0x1d7   :  { %v1694_v16 = vpack.c.bf16 %v1461_v51, %v1460_v14  ;;  %v1473_v9 = vmax.f32 %v1243_v26, 0.0  ;;  %v1245_v62 = vadd.f32 %v1244_v35, %v3526_v61 }
 0x1d8   :  { %v1248_v20 = vpop.f32.mrf.mxu0 }
 0x1d9   :  { %1630 = vst [vmem:[%s3636_s3 + $0x10] sm:$0xff] %v1694_v16  ;;  %v1474_v27 = vmax.f32 %v1245_v62, 0.0  ;;  %v1249_v63 = vadd.f32 %v1248_v20, %v3530_v36 }
 0x1da   :  { %v1250_v5 = vpop.f32.mrf.mxu0 }
 0x1db   :  { %v1701_v33 = vpack.c.bf16 %v1474_v27, %v1473_v9  ;;  %v1486_v49 = vmax.f32 %v1249_v63, 0.0  ;;  %v1251_v37 = vadd.f32 %v1250_v5, %v3530_v36 }
 0x1dc   :  { %v1252_v56 = vpop.f32.mrf.mxu0 }
 0x1dd   :  { %1638 = vst [vmem:[%s3636_s3 + $0x44] sm:$0xff] %v1701_v33  ;;  %v1487_v29 = vmax.f32 %v1251_v37, 0.0 }
 0x1de   :  { %v1253_v47 = vpop.f32.mrf.mxu0 }
 0x1df   :  { %v1708_v30 = vpack.c.bf16 %v1487_v29, %v1486_v49 }
 0x1e1   :  { %1645 = vst [vmem:[%s3636_s3 + $0x78] sm:$0x33] %v1708_v30 }
 0x1ef   :  { %v1289_v11 = vpop.f32.mrf.mxu1 }
 0x1f0   :  { %v1290_v52 = vadd.f32 %v1289_v11, %v3523_v59 }
 0x1f1   :  { %v1291_v0 = vpop.f32.mrf.mxu1 }
 0x1f2   :  { %v1462_v40 = vmax.f32 %v1290_v52, 0.0  ;;  %v1292_v45 = vadd.f32 %v1291_v0, %v3523_v59 }
 0x1f3   :  { %v1293_v22 = vpop.f32.mrf.mxu1 }
 0x1f4   :  { %v1463_v17 = vmax.f32 %v1292_v45, 0.0  ;;  %v1294_v10 = vadd.f32 %v1293_v22, %v3526_v61 }
 0x1f5   :  { %v1295_v28 = vpop.f32.mrf.mxu1 }
 0x1f6   :  { %v1695_v8 = vpack.c.bf16 %v1463_v17, %v1462_v40  ;;  %v1475_v48 = vmax.f32 %v1294_v10, 0.0  ;;  %v1296_v50 = vadd.f32 %v1295_v28, %v3526_v61 }
 0x1f7   :  { %v1299_v42 = vpop.f32.mrf.mxu1 }
 0x1f8   :  { %1631 = vst [vmem:[%s3636_s3 + $0x18] sm:$0xff] %v1695_v8  ;;  %v1476_v57 = vmax.f32 %v1296_v50, 0.0  ;;  %v1300_v1 = vadd.f32 %v1299_v42, %v3530_v36 }
 0x1f9   :  { %v1301_v54 = vpop.f32.mrf.mxu1 }
 0x1fa   :  { %v1702_v38 = vpack.c.bf16 %v1476_v57, %v1475_v48  ;;  %v1488_v3 = vmax.f32 %v1300_v1, 0.0  ;;  %v1302_v34 = vadd.f32 %v1301_v54, %v3530_v36 }
 0x1fb   :  { %v1303_v53 = vpop.f32.mrf.mxu1 }
 0x1fc   :  { %1639 = vst [vmem:[%s3636_s3 + $0x4c] sm:$0xff] %v1702_v38  ;;  %v1489_v19 = vmax.f32 %v1302_v34, 0.0 }
 0x1fd   :  { %v1340_v21 = vpop.f32.mrf.mxu0  ;;  %v1304_v41 = vpop.f32.mrf.mxu1 }
 0x1fe   :  { %v1341_v23 = vadd.f32 %v1340_v21, %v3523_v59  ;;  %v1709_v7 = vpack.c.bf16 %v1489_v19, %v1488_v3 }
 0x1ff   :  { %v1342_v13 = vpop.f32.mrf.mxu0 }
 0x200   :  { %v1464_v12 = vmax.f32 %v1341_v23, 0.0  ;;  %v1343_v44 = vadd.f32 %v1342_v13, %v3523_v59  ;;  %1646 = vst [vmem:[%s3636_s3 + $0x80] sm:$0x33] %v1709_v7 }
 0x201   :  { %v1344_v55 = vpop.f32.mrf.mxu0 }
 0x202   :  { %v1465_v6 = vmax.f32 %v1343_v44, 0.0  ;;  %v1345_v24 = vadd.f32 %v1344_v55, %v3526_v61 }
 0x203   :  { %v1346_v15 = vpop.f32.mrf.mxu0 }
 0x204   :  { %v1696_v39 = vpack.c.bf16 %v1465_v6, %v1464_v12  ;;  %v1477_v60 = vmax.f32 %v1345_v24, 0.0  ;;  %v1347_v2 = vadd.f32 %v1346_v15, %v3526_v61 }
 0x205   :  { %v1350_v18 = vpop.f32.mrf.mxu0 }
 0x206   :  { %1632 = vst [vmem:[%s3636_s3 + $0x20] sm:$0xff] %v1696_v39  ;;  %v1478_v46 = vmax.f32 %v1347_v2, 0.0  ;;  %v1351_v31 = vadd.f32 %v1350_v18, %v3530_v36 }
 0x207   :  { %v1352_v4 = vpop.f32.mrf.mxu0 }
 0x208   :  { %v1703_v32 = vpack.c.bf16 %v1478_v46, %v1477_v60  ;;  %v1490_v43 = vmax.f32 %v1351_v31, 0.0  ;;  %v1353_v14 = vadd.f32 %v1352_v4, %v3530_v36 }
 0x209   :  { %v1354_v25 = vpop.f32.mrf.mxu0 }
 0x20a   :  { %1640 = vst [vmem:[%s3636_s3 + $0x54] sm:$0xff] %v1703_v32  ;;  %v1491_v58 = vmax.f32 %v1353_v14, 0.0 }
 0x20b   :  { %v1355_v51 = vpop.f32.mrf.mxu0 }
 0x20c   :  { %v1710_v26 = vpack.c.bf16 %v1491_v58, %v1490_v43 }
 0x20e   :  { %1647 = vst [vmem:[%s3636_s3 + $0x88] sm:$0x33] %v1710_v26 }
 0x216   :  { %v1720_v35 = vpop.f32.mrf.mxu0 }
 0x217   :  { %v1391_v16 = vpop.f32.mrf.mxu1  ;;  %v1451_v9 = vadd.f32 %v1720_v35, %v3530_v36 }
 0x218   :  { %v1392_v62 = vadd.f32 %v1391_v16, %v3523_v59  ;;  %v1442_v20 = vpop.f32.mrf.mxu0 }
 0x219   :  { %v1393_v27 = vpop.f32.mrf.mxu1  ;;  %v1494_v63 = vmax.f32 %v1451_v9, 0.0  ;;  %v1443_v5 = vadd.f32 %v1442_v20, %v3523_v59 }
 0x21a   :  { %v1394_v33 = vadd.f32 %v1393_v27, %v3523_v59  ;;  %v1721_v49 = vpop.f32.mrf.mxu0  ;;  %v1466_v47 = vmax.f32 %v1392_v62, 0.0 }
 0x21b   :  { %v1395_v37 = vpop.f32.mrf.mxu1  ;;  %v1712_v56 = vpack.c.bf16 %v1494_v63, %v1494_v63  ;;  %v1468_v29 = vmax.f32 %v1443_v5, 0.0 }
 0x21c   :  { %v1467_v30 = vmax.f32 %v1394_v33, 0.0  ;;  %v1396_v11 = vadd.f32 %v1395_v37, %v3526_v61  ;;  %v1445_v52 = vpop.f32.mrf.mxu0 }
 0x21d   :  { %1650 = vst.msk [vmem:[%s3636_s3 + $0x98] sm:$0x3] %vm1649_vm5, %v1712_v56  ;;  %v1397_v0 = vpop.f32.mrf.mxu1  ;;  %v1698_v40 = vpack.c.bf16 %v1468_v29, %v1468_v29  ;;  %v1446_v45 = vadd.f32 %v1445_v52, %v3526_v61 }
 0x21e   :  { %v1697_v59 = vpack.c.bf16 %v1467_v30, %v1466_v47  ;;  %v1398_v22 = vadd.f32 %v1397_v0, %v3526_v61  ;;  %v1479_v28 = vmax.f32 %v1396_v11, 0.0 }
 0x21f   :  { %1635 = vst.msk [vmem:[%s3636_s3 + $0x30] sm:$0xf] %vm1634_vm14, %v1698_v40  ;;  %v1401_v17 = vpop.f32.mrf.mxu1  ;;  %v1481_v10 = vmax.f32 %v1446_v45, 0.0 }
 0x220   :  { %1633 = vst [vmem:[%s3636_s3 + $0x28] sm:$0xff] %v1697_v59  ;;  %v1480_v8 = vmax.f32 %v1398_v22, 0.0  ;;  %v1402_v48 = vadd.f32 %v1401_v17, %v3530_v36 }
 0x221   :  { %v1403_v50 = vpop.f32.mrf.mxu1  ;;  %v1705_v42 = vpack.c.bf16 %v1481_v10, %v1481_v10 }
 0x222   :  { %v1704_v57 = vpack.c.bf16 %v1480_v8, %v1479_v28  ;;  %v1404_v61 = vadd.f32 %v1403_v50, %v3530_v36  ;;  %v1492_v54 = vmax.f32 %v1402_v48, 0.0 }
 0x223   :  { %1642 = vst.msk [vmem:[%s3636_s3 + $0x64] sm:$0xf] %vm1634_vm14, %v1705_v42  ;;  %v1405_v1 = vpop.f32.mrf.mxu1 }
 0x224   :  { %1641 = vst [vmem:[%s3636_s3 + $0x5c] sm:$0xff] %v1704_v57  ;;  %v1493_v38 = vmax.f32 %v1404_v61, 0.0 }
 0x225   :  { %v1406_v3 = vpop.f32.mrf.mxu1 }
 0x226   :  { %v1711_v34 = vpack.c.bf16 %v1493_v38, %v1492_v54 }
 0x228   :  { %1648 = vst [vmem:[%s3636_s3 + $0x90] sm:$0x33] %v1711_v34 }

// kernel: cnn2_forward.4
= control target key start
LH: loop header
LB: loop body
LE: loop exit
PB: predicated region body
PF: predicated region fallthrough
CT: control target
= control target key end

     0   :  { %v628_v1 = vmov 0   ;;  %vm286_vm0 = vcmask 523264   ;;  %s630_s26 = smov 28   ;;  %vm446_vm1 = vcmask 228352   ;;  %vm493_vm2 = vcmask 404480   ;;  %s809_s0 = inlined_call_operand.vmem [shape: bf16[1,320,200], index: 0, kind: input, shape index: {}]   ;;  %s810_s1 = inlined_call_operand.vmem [shape: bf16[20,320], index: 1, kind: input, shape index: {}]   ;;  %s811_s2 = inlined_call_operand.vmem [shape: f32[20,1], index: 2, kind: input, shape index: {}]   ;;  %s812_s3 = inlined_call_operand.vmem [shape: bf16[1,20,50], index: 3, kind: output, shape index: {}]  }
   0x1   :  { %v561_v0 = vld [vmem:[%s809_s0 + $0x74] ss:$8 sps:$4 sm:$0xff]   ;;  %376 = vmatprep.mubr.bf16.mxu1 %v628_v1  ;;  %560 = vset.pattern.permute.xlu0 %v628_v1  ;;  %v563_v2 = vld [vmem:[%s809_s0 + $0x70] ss:$8 sps:$4 sm:$0xff]   ;;  %v564_v3 = vld [vmem:[%s809_s0 + $0x64] ss:$8 sps:$4 sm:$0xff]  }
   0x2   :  { %559 = vset.pattern.permute.xlu1 %v628_v1  ;;  %293 = vmatprep.subr.bf16.mxu0 %v561_v0  ;;  %v566_v4 = vld [vmem:[%s809_s0 + $0x60] ss:$8 sps:$4 sm:$0xff]   ;;  %v567_v5 = vld [vmem:[%s809_s0 + $0x54] ss:$8 sps:$4 sm:$0xff]   ;;  %v569_v6 = vld [vmem:[%s809_s0 + $0x50] ss:$8 sps:$4 sm:$0xff]  }
   0x3   :  { %294 = vmatpush1.bf16.msra.mxu0 %v563_v2  ;;  %v570_v7 = vld [vmem:[%s809_s0 + $0x44] ss:$8 sps:$4 sm:$0xff]   ;;  %v572_v8 = vld [vmem:[%s809_s0 + $0x40] ss:$8 sps:$4 sm:$0xff]   ;;  %v573_v9 = vld [vmem:[%s809_s0 + $0x34] ss:$8 sps:$4 sm:$0xff]  }
   0x4   :  { %295 = vmatprep.subr.bf16.mxu0 %v564_v3  ;;  %v575_v10 = vld [vmem:[%s809_s0 + $0x30] ss:$8 sps:$4 sm:$0xff]   ;;  %v594_v11 = vld [vmem:[%s809_s0 + $0x134] ss:$8 sps:$4 sm:$0xff]   ;;  %v576_v13 = vld [vmem:[%s809_s0 + $0x24] ss:$8 sps:$4 sm:$0xff]  }
   0x5   :  { %v596_v12 = vld [vmem:[%s809_s0 + $0x130] ss:$8 sps:$4 sm:$0xff]   ;;  %352 = vmatprep.subr.bf16.mxu1 %v594_v11  ;;  %v600_v14 = vld [vmem:[%s809_s0 + $0x124] ss:$8 sps:$4 sm:$0xff]   ;;  %v602_v15 = vld [vmem:[%s809_s0 + $0x120] ss:$8 sps:$4 sm:$0xff]  }
   0x6   :  { %353 = vmatpush1.bf16.msra.mxu1 %v596_v12  ;;  %v578_v16 = vld [vmem:[%s809_s0 + $0x20] ss:$8 sps:$4 sm:$0xff]   ;;  %v579_v17 = vld [vmem:[%s809_s0 + $0x14] ss:$8 sps:$4 sm:$0xff]   ;;  %v608_v19 = vld [vmem:[%s809_s0 + $0x110] ss:$8 sps:$4 sm:$0xff]  }
   0x7   :  { %296 = vmatpush1.bf16.msra.mxu0 %v566_v4  ;;  %354 = vmatprep.subr.bf16.mxu1 %v600_v14  ;;  %v606_v18 = vld [vmem:[%s809_s0 + $0x114] ss:$8 sps:$4 sm:$0xff]   ;;  %v581_v20 = vld [vmem:[%s809_s0 + $0x10] ss:$8 sps:$4 sm:$0xff]   ;;  %v612_v21 = vld [vmem:[%s809_s0 + $0x104] ss:$8 sps:$4 sm:$0xff]  }
   0x8   :  { %297 = vmatprep.subr.bf16.mxu0 %v567_v5  ;;  %v582_v22 = vld [vmem:[%s809_s0 + $0x4] ss:$8 sps:$4 sm:$0xff]   ;;  %v614_v23 = vld [vmem:[%s809_s0 + $0x100] ss:$8 sps:$4 sm:$0xff]   ;;  %v585_v25 = vld [vmem:[%s809_s0 + $0xf4] ss:$8 sps:$4 sm:$0xff]  }
   0x9   :  { %v584_v24 = vld [vmem:[%s809_s0] ss:$8 sps:$4 sm:$0xff]   ;;  %v624_v26 = vld [vmem:[%s810_s1 + $0x4] ss:$12 sps:$4 sm:$0xff]   ;;  %v591_v31 = vld [vmem:[%s809_s0 + $0xd4] ss:$8 sps:$4 sm:$0xff]  }
   0xa   :  { %355 = vmatpush1.bf16.msra.mxu1 %v602_v15  ;;  %v618_v27 = vld [vmem:[%s810_s1 + $0x8] ss:$12 sps:$4 sm:$0xff]   ;;  %325 = vmatprep.mubr.bf16.mxu0 %v624_v26  ;;  %v587_v28 = vld [vmem:[%s809_s0 + $0xf0] ss:$8 sps:$4 sm:$0xff]   ;;  %v588_v29 = vld [vmem:[%s809_s0 + $0xe4] ss:$8 sps:$4 sm:$0xff]  }
   0xb   :  { %298 = vmatpush1.bf16.msra.mxu0 %v569_v6  ;;  %356 = vmatprep.subr.bf16.mxu1 %v606_v18  ;;  %v590_v30 = vld [vmem:[%s809_s0 + $0xe0] ss:$8 sps:$4 sm:$0xff]   ;;  %v593_v33 = vld [vmem:[%s809_s0 + $0xd0] ss:$8 sps:$4 sm:$0xff]   ;;  %v597_v34 = vld [vmem:[%s809_s0 + $0xc4] ss:$8 sps:$4 sm:$0xff]  }
   0xc   :  { %299 = vmatprep.subr.bf16.mxu0 %v570_v7  ;;  %v625_v32 = vld [vmem:[%s810_s1 + $0x20] ss:$0 sps:$4 sm:$0x33]   ;;  %v603_v36 = vld [vmem:[%s809_s0 + $0xb4] ss:$8 sps:$4 sm:$0xff]   ;;  %v457_v0 = vld [vmem:[%s811_s2 + $0x8] sm:$0xff] }
   0xd   :  { %v599_v35 = vld [vmem:[%s809_s0 + $0xc0] ss:$8 sps:$4 sm:$0xff]   ;;  %v605_v37 = vld [vmem:[%s809_s0 + $0xb0] ss:$8 sps:$4 sm:$0xff]   ;;  %v609_v38 = vld [vmem:[%s809_s0 + $0xa4] ss:$8 sps:$4 sm:$0xff]  }
   0xe   :  { %357 = vmatpush1.bf16.msra.mxu1 %v608_v19  ;;  %v611_v39 = vld [vmem:[%s809_s0 + $0xa0] ss:$8 sps:$4 sm:$0xff]   ;;  %v615_v40 = vld [vmem:[%s809_s0 + $0x94] ss:$8 sps:$4 sm:$0xff]   ;;  %v617_v41 = vld [vmem:[%s809_s0 + $0x90] ss:$8 sps:$4 sm:$0xff]  }
   0xf   :  { %300 = vmatpush1.bf16.msra.mxu0 %v572_v8  ;;  %358 = vmatprep.subr.bf16.mxu1 %v612_v21  ;;  %v619_v42 = vld [vmem:[%s809_s0 + $0x84] ss:$8 sps:$4 sm:$0xff]   ;;  %v621_v43 = vld [vmem:[%s809_s0 + $0x80] ss:$8 sps:$4 sm:$0xff]   ;;  %v19_v44 = vld [vmem:[%s810_s1 + $0x18] sm:$0x33] }
  0x10   :  { %301 = vmatprep.subr.bf16.mxu0 %v573_v9  ;;  %v622_v45 = vld [vmem:[%s810_s1] ss:$12 sps:$4 sm:$0xff]   ;;  %v506_v46 = vcombine.high %v19_v44, %v19_v44  ;;  %v505_v47 = vcombine.low %v19_v44, %v19_v44  ;;  %s629_s0 = smov 78   ;;  %v458_v6 = vld [vmem:[%s811_s2 + $0x10] sm:$0xf]  ;;  %vm496_vm3 = vcmask 402432  }
  0x11   :  { %v456_v4 = vld [vmem:[%s811_s2] sm:$0xff] }
  0x12   :  { %359 = vmatpush1.bf16.msra.mxu1 %v614_v23 }
  0x13   :  { %302 = vmatpush1.bf16.msra.mxu0 %v575_v10 }
  0x14   :  { %303 = vmatprep.subr.bf16.mxu0 %v576_v13 }
  0x15   :  { %548 = vmatmul.mubr.msk.bf16.vlgmr.msra.gmra.mxu1 %vm286_vm0, %v618_v27 }
  0x16   :  { %386 = vmatprep.mubr.bf16.mxu1 %v628_v1 }
  0x17   :  { %304 = vmatpush1.bf16.msra.mxu0 %v578_v16 }
  0x18   :  { %305 = vmatprep.subr.bf16.mxu0 %v579_v17 }
  0x1b   :  { %306 = vmatpush1.bf16.msra.mxu0 %v581_v20 }
  0x1c   :  { %307 = vmatprep.subr.bf16.mxu0 %v582_v22 }
  0x1d   :  { %549 = vmatmul.mubr.msk.bf16.gmra.mxu1 %vm286_vm0, %v625_v32 }
  0x1f   :  { %308 = vmatpush1.bf16.msra.mxu0 %v584_v24 }
  0x20   :  { %309 = vmatprep.subr.bf16.mxu0 %v585_v25 }
  0x23   :  { %310 = vmatpush2.bf16.msra.mxu0 %v587_v28 }
  0x24   :  { %311 = vmatprep.subr.bf16.mxu0 %v588_v29 }
  0x27   :  { %312 = vmatpush2.bf16.msra.mxu0 %v590_v30 }
  0x28   :  { %313 = vmatprep.subr.bf16.mxu0 %v591_v31 }
  0x2b   :  { %314 = vmatpush2.bf16.msra.mxu0 %v593_v33 }
  0x2c   :  { %315 = vmatprep.subr.bf16.mxu0 %v597_v34 }
  0x2f   :  { %316 = vmatpush2.bf16.msra.mxu0 %v599_v35 }
  0x30   :  { %317 = vmatprep.subr.bf16.mxu0 %v603_v36 }
  0x33   :  { %318 = vmatpush2.bf16.msra.mxu0 %v605_v37 }
  0x34   :  { %319 = vmatprep.subr.bf16.mxu0 %v609_v38 }
  0x37   :  { %320 = vmatpush2.bf16.msra.mxu0 %v611_v39 }
  0x38   :  { %321 = vmatprep.subr.bf16.mxu0 %v615_v40 }
  0x3b   :  { %322 = vmatpush2.bf16.msra.mxu0 %v617_v41 }
  0x3c   :  { %323 = vmatprep.subr.bf16.mxu0 %v619_v42 }
  0x3f   :  { %324 = vmatpush2.bf16.msra.mxu0 %v621_v43 }
  0x42   :  { %326 = vmatmul.mubr.bf16.vlgmr.msra.gmra.mxu0 %v622_v45 }
  0x43   :  { %335 = vmatprep.mubr.bf16.mxu0 %v506_v46 }
  0x4a   :  { %336 = vmatmul.mubr.bf16.gmra.mxu0 %v505_v47 }
  0xd5   :  { %v378_v48 = vpop.f32.mrf.mxu1 }
  0xd7   :  { %v380_v49 = vpop.f32.mrf.mxu1 }
  0xd9   :  { %v382_v50 = vpop.f32.mrf.mxu1 }
  0xdb   :  { %v384_v51 = vpop.f32.mrf.mxu1 }
  0xdd   :  { %v388_v52 = vpop.f32.mrf.mxu1 }
  0xdf   :  { %v390_v53 = vpop.f32.mrf.mxu1 }
  0xe1   :  { %v392_v54 = vpop.f32.mrf.mxu1 }
  0xe3   :  { %v393_v55 = vpop.f32.mrf.mxu1 }
 0x102   :  { %v327_v56 = vpop.f32.mrf.mxu0 }
 0x103   :  { %v379_v7 = vadd.f32 %v378_v48, %v327_v56 }
 0x104   :  { %v329_v57 = vpop.f32.mrf.mxu0 }
 0x105   :  { %v381_v58 = vadd.f32 %v380_v49, %v329_v57 }
 0x106   :  { %v331_v59 = vpop.f32.mrf.mxu0 }
 0x107   :  { %413 = vrot.lane.b32.xlu0 %v381_v58, %s629_s0  ;;  %v383_v5 = vadd.f32 %v382_v50, %v331_v59 }
 0x108   :  { %v333_v60 = vpop.f32.mrf.mxu0 }
 0x109   :  { %v385_v61 = vadd.f32 %v384_v51, %v333_v60 }
 0x10a   :  { %v337_v62 = vpop.f32.mrf.mxu0 }
 0x10b   :  { %415 = vrot.lane.b32.xlu0 %v385_v61, %s629_s0  ;;  %v389_v8 = vadd.f32 %v388_v52, %v337_v62 }
 0x10c   :  { %v339_v63 = vpop.f32.mrf.mxu0 }
 0x10d   :  { %v391_v1 = vadd.f32 %v390_v53, %v339_v63 }
 0x10e   :  { %v341_v2 = vpop.f32.mrf.mxu0 }
 0x10f   :  { %466 = vperm.xlu0 %560, %v457_v0   ;;  %417 = vrot.lane.b32.xlu1 %v391_v1, %s629_s0 }
 0x110   :  { %v342_v3 = vpop.f32.mrf.mxu0 }
 0x113   :  { %400 = vrot.lane.b32.xlu0 %v383_v5, %s629_s0  ;;  %461 = vperm.xlu1 %559, %v456_v4  }
 0x117   :  { %471 = vperm.xlu1 %559, %v458_v6  }
 0x11b   :  { %398 = vrot.lane.b32.xlu1 %v379_v7, %s629_s0 }
 0x11f   :  { %402 = vrot.lane.b32.xlu1 %v389_v8, %s629_s0 }
 0x179   :  { %v414_v9 = vpop.permute.xlu0 %413 }
 0x17a   :  { %v422_v10 = vmax.f32 %v379_v7, %v414_v9  ;;  %v423_v11 = vmax.f32 %v381_v58, %v414_v9 }
 0x17c   :  { %434 = vrot.lane.b32.xlu0 %v422_v10, %s630_s26  ;;  %436 = vrot.lane.b32.xlu1 %v423_v11, %s630_s26 }
 0x17d   :  { %v416_v12 = vpop.permute.xlu0 %415 }
 0x17e   :  { %v424_v13 = vmax.f32 %v383_v5, %v416_v12  ;;  %v425_v14 = vmax.f32 %v385_v61, %v416_v12 }
 0x180   :  { %438 = vrot.lane.b32.xlu0 %v424_v13, %s630_s26  ;;  %440 = vrot.lane.b32.xlu1 %v425_v14, %s630_s26 }
 0x181   :  { %v418_v15 = vpop.permute.xlu1 %417 }
 0x182   :  { %v426_v16 = vmax.f32 %v389_v8, %v418_v15  ;;  %v427_v17 = vmax.f32 %v391_v1, %v418_v15 }
 0x184   :  { %444 = vrot.lane.b32.xlu1 %v427_v17, %s630_s26  ;;  %442 = vrot.lane.b32.xlu0 %v426_v16, %s630_s26 }
 0x18a   :  { %v467_v20 = vpop.permute.xlu0 %466 }
 0x18e   :  { %v462_v18 = vpop.permute.xlu1 %461  ;;  %v401_v22 = vpop.permute.xlu0 %400 }
 0x18f   :  { %v408_v29 = vmax.f32 %v383_v5, %v401_v22 }
 0x192   :  { %v472_v19 = vpop.permute.xlu1 %471 }
 0x196   :  { %v399_v21 = vpop.permute.xlu1 %398 }
 0x197   :  { %v407_v24 = vmax.f32 %v379_v7, %v399_v21 }
 0x19a   :  { %v403_v23 = vpop.permute.xlu1 %402 }
 0x19b   :  { %v409_v36 = vmax.f32 %v389_v8, %v403_v23 }
 0x1ee   :  { %v435_v25 = vpop.permute.xlu0 %434  ;;  %v437_v26 = vpop.permute.xlu1 %436 }
 0x1ef   :  { %v447_v27 = vsel %vm446_vm1, %v435_v25, %v437_v26 }
 0x1f0   :  { %v453_v28 = vmax.f32 %v407_v24, %v447_v27 }
 0x1f2   :  { %v474_v30 = vadd.f32 %v462_v18, %v453_v28  ;;  %v439_v31 = vpop.permute.xlu0 %438  ;;  %v441_v32 = vpop.permute.xlu1 %440 }
 0x1f3   :  { %v448_v33 = vsel %vm446_vm1, %v439_v31, %v441_v32 }
 0x1f4   :  { %v477_v34 = vmax.f32 %v474_v30, 0.0  ;;  %v454_v35 = vmax.f32 %v408_v29, %v448_v33 }
 0x1f6   :  { %v553_v37 = vpack.c.bf16 %v477_v34, %v477_v34  ;;  %v475_v38 = vadd.f32 %v467_v20, %v454_v35  ;;  %v443_v39 = vpop.permute.xlu0 %442  ;;  %v445_v40 = vpop.permute.xlu1 %444 }
 0x1f7   :  { %v449_v41 = vsel %vm446_vm1, %v443_v39, %v445_v40 }
 0x1f8   :  { %494 = vst.msk [vmem:[%s812_s3] sm:$0xf] %vm493_vm2, %v553_v37  ;;  %v478_v42 = vmax.f32 %v475_v38, 0.0  ;;  %v455_v43 = vmax.f32 %v409_v36, %v449_v41 }
 0x1fa   :  { %v554_v44 = vpack.c.bf16 %v478_v42, %v478_v42  ;;  %v476_v45 = vadd.f32 %v472_v19, %v455_v43 }
 0x1fc   :  { %495 = vst.msk [vmem:[%s812_s3 + $0x4] sm:$0xf] %vm493_vm2, %v554_v44  ;;  %v479_v46 = vmax.f32 %v476_v45, 0.0 }
 0x1fe   :  { %v555_v47 = vpack.c.bf16 %v479_v46, %v479_v46 }
 0x200   :  { %497 = vst.msk [vmem:[%s812_s3 + $0x8] sm:$0x3] %vm496_vm3, %v555_v47 }

// kernel: cnn2_forward.5
= control target key start
LH: loop header
LB: loop body
LE: loop exit
PB: predicated region body
PF: predicated region fallthrough
CT: control target
= control target key end

     0   :  { %vm445_vm0 = vcmask 1041408   ;;  %v88_v40 = vlaneseq  ;;  %v970_v41 = vmov 1966171168   ;;  %vm441_vm1 = vcmask 949248   ;;  %s1257_s0 = inlined_call_operand.vmem [shape: bf16[2,500], index: 0, kind: input, shape index: {}]   ;;  %s1258_s1 = inlined_call_operand.vmem [shape: bf16[500,256], index: 1, kind: input, shape index: {}]   ;;  %s1259_s2 = inlined_call_operand.vmem [shape: f32[1,256], index: 2, kind: input, shape index: {}]   ;;  %s1260_s3 = inlined_call_operand.vmem [shape: bf16[256,10], index: 3, kind: input, shape index: {}]   ;;  %s1261_s4 = inlined_call_operand.vmem [shape: f32[1,10], index: 4, kind: input, shape index: {}]   ;;  %s1262_s5 = inlined_call_operand.hbm [shape: f32[2,10], index: 5, kind: output, shape index: {}]  }
   0x1   :  { %v837_v0 = vld [vmem:[%s1258_s1 + $0x74] ss:$8 sps:$4 sm:$0xff]   ;;  %v841_v2 = vld [vmem:[%s1258_s1 + $0x70] ss:$8 sps:$4 sm:$0xff]   ;;  %v843_v4 = vld [vmem:[%s1258_s1 + $0x64] ss:$8 sps:$4 sm:$0xff]   ;;  %v108_v42 = vunpack.c.l.s4 %v970_v41 }
   0x2   :  { %v839_v1 = vld [vmem:[%s1258_s1 + $0x174] ss:$8 sps:$4 sm:$0xff]   ;;  %452 = vmatprep.subr.bf16.mxu0 %v837_v0  ;;  %v842_v3 = vld [vmem:[%s1258_s1 + $0x170] ss:$8 sps:$4 sm:$0xff]   ;;  %v845_v5 = vld [vmem:[%s1258_s1 + $0x164] ss:$8 sps:$4 sm:$0xff]  }
   0x3   :  { %493 = vmatprep.subr.bf16.mxu1 %v839_v1  ;;  %453 = vmatpush1.bf16.msra.mxu0 %v841_v2  ;;  %v847_v6 = vld [vmem:[%s1258_s1 + $0x60] ss:$8 sps:$4 sm:$0xff]   ;;  %v849_v8 = vld [vmem:[%s1258_s1 + $0x54] ss:$8 sps:$4 sm:$0xff]   ;;  %v853_v10 = vld [vmem:[%s1258_s1 + $0x50] ss:$8 sps:$4 sm:$0xff]   ;;  %v109_v48 = vunpack.c.0.s8 %v108_v42 }
   0x4   :  { %494 = vmatpush1.bf16.msra.mxu1 %v842_v3  ;;  %454 = vmatprep.subr.bf16.mxu0 %v843_v4  ;;  %v848_v7 = vld [vmem:[%s1258_s1 + $0x160] ss:$8 sps:$4 sm:$0xff]   ;;  %v851_v9 = vld [vmem:[%s1258_s1 + $0x154] ss:$8 sps:$4 sm:$0xff]   ;;  %v854_v11 = vld [vmem:[%s1258_s1 + $0x150] ss:$8 sps:$4 sm:$0xff]  }
   0x5   :  { %495 = vmatprep.subr.bf16.mxu1 %v845_v5  ;;  %v855_v12 = vld [vmem:[%s1258_s1 + $0x44] ss:$8 sps:$4 sm:$0xff]   ;;  %v859_v14 = vld [vmem:[%s1258_s1 + $0x40] ss:$8 sps:$4 sm:$0xff]   ;;  %v861_v16 = vld [vmem:[%s1258_s1 + $0x34] ss:$8 sps:$4 sm:$0xff]  }
   0x6   :  { %v857_v13 = vld [vmem:[%s1258_s1 + $0x144] ss:$8 sps:$4 sm:$0xff]   ;;  %v860_v15 = vld [vmem:[%s1258_s1 + $0x140] ss:$8 sps:$4 sm:$0xff]   ;;  %v863_v17 = vld [vmem:[%s1258_s1 + $0x134] ss:$8 sps:$4 sm:$0xff]  }
   0x7   :  { %455 = vmatpush1.bf16.msra.mxu0 %v847_v6  ;;  %v865_v18 = vld [vmem:[%s1258_s1 + $0x30] ss:$8 sps:$4 sm:$0xff]   ;;  %v867_v20 = vld [vmem:[%s1258_s1 + $0x24] ss:$8 sps:$4 sm:$0xff]   ;;  %v871_v22 = vld [vmem:[%s1258_s1 + $0x20] ss:$8 sps:$4 sm:$0xff]  }
   0x8   :  { %496 = vmatpush1.bf16.msra.mxu1 %v848_v7  ;;  %456 = vmatprep.subr.bf16.mxu0 %v849_v8  ;;  %v866_v19 = vld [vmem:[%s1258_s1 + $0x130] ss:$8 sps:$4 sm:$0xff]   ;;  %v869_v21 = vld [vmem:[%s1258_s1 + $0x124] ss:$8 sps:$4 sm:$0xff]   ;;  %v872_v23 = vld [vmem:[%s1258_s1 + $0x120] ss:$8 sps:$4 sm:$0xff]  }
   0x9   :  { %497 = vmatprep.subr.bf16.mxu1 %v851_v9  ;;  %v873_v24 = vld [vmem:[%s1258_s1 + $0x14] ss:$8 sps:$4 sm:$0xff]   ;;  %v877_v26 = vld [vmem:[%s1258_s1 + $0x10] ss:$8 sps:$4 sm:$0xff]   ;;  %v879_v28 = vld [vmem:[%s1258_s1 + $0x4] ss:$8 sps:$4 sm:$0xff]  }
   0xa   :  { %v875_v25 = vld [vmem:[%s1258_s1 + $0x114] ss:$8 sps:$4 sm:$0xff]   ;;  %v878_v27 = vld [vmem:[%s1258_s1 + $0x110] ss:$8 sps:$4 sm:$0xff]   ;;  %v881_v29 = vld [vmem:[%s1258_s1 + $0x104] ss:$8 sps:$4 sm:$0xff]  }
   0xb   :  { %457 = vmatpush1.bf16.msra.mxu0 %v853_v10  ;;  %v85_v30 = vld [vmem:[%s1258_s1 + $0x1f0] sm:$0x33]  ;;  %v883_v31 = vld [vmem:[%s1258_s1] ss:$8 sps:$4 sm:$0xff]   ;;  %v890_v38 = vld [vmem:[%s1258_s1 + $0xe4] ss:$8 sps:$4 sm:$0xff]  }
   0xc   :  { %498 = vmatpush1.bf16.msra.mxu1 %v854_v11  ;;  %458 = vmatprep.subr.bf16.mxu0 %v855_v12  ;;  %v884_v32 = vld [vmem:[%s1258_s1 + $0x100] ss:$8 sps:$4 sm:$0xff]   ;;  %v885_v33 = vld [vmem:[%s1258_s1 + $0xf4] ss:$8 sps:$4 sm:$0xff]   ;;  %v793_v34 = vcombine.high %v85_v30, %v85_v30  ;;  %v792_v35 = vcombine.low %v85_v30, %v85_v30  ;;  %v888_v36 = vld [vmem:[%s1258_s1 + $0xf0] ss:$8 sps:$4 sm:$0xff]  }
   0xd   :  { %499 = vmatprep.subr.bf16.mxu1 %v857_v13  ;;  %v892_v39 = vld [vmem:[%s1258_s1 + $0x1e4] ss:$8 sps:$4 sm:$0xff]   ;;  %v894_v43 = vld [vmem:[%s1258_s1 + $0xe0] ss:$8 sps:$4 sm:$0xff]   ;;  %v896_v45 = vld [vmem:[%s1258_s1 + $0xd4] ss:$8 sps:$4 sm:$0xff]  }
   0xe   :  { %v447_v37 = vsel %vm445_vm0, %v792_v35, 0  ;;  %v895_v44 = vld [vmem:[%s1258_s1 + $0x1e0] ss:$8 sps:$4 sm:$0xff]   ;;  %v898_v46 = vld [vmem:[%s1258_s1 + $0x1d4] ss:$8 sps:$4 sm:$0xff]   ;;  %v1125_v47 = vshrl.u32 %v88_v40, 7 }
   0xf   :  { %459 = vmatpush1.bf16.msra.mxu0 %v859_v14  ;;  %v900_v49 = vld [vmem:[%s1258_s1 + $0xd0] ss:$8 sps:$4 sm:$0xff]   ;;  %v902_v51 = vld [vmem:[%s1258_s1 + $0xc4] ss:$8 sps:$4 sm:$0xff]   ;;  %v906_v54 = vld [vmem:[%s1258_s1 + $0xc0] ss:$8 sps:$4 sm:$0xff]  }
  0x10   :  { %500 = vmatpush1.bf16.msra.mxu1 %v860_v15  ;;  %460 = vmatprep.subr.bf16.mxu0 %v861_v16  ;;  %v901_v50 = vld [vmem:[%s1258_s1 + $0x1d0] ss:$8 sps:$4 sm:$0xff]   ;;  %v904_v52 = vld [vmem:[%s1258_s1 + $0x1c4] ss:$8 sps:$4 sm:$0xff]   ;;  %v112_v53 = vsub.s32 %v109_v48, %v1125_v47  ;;  %v907_v56 = vld [vmem:[%s1258_s1 + $0x1c0] ss:$8 sps:$4 sm:$0xff]  }
  0x11   :  { %501 = vmatprep.subr.bf16.mxu1 %v863_v17  ;;  %v729_v55 = vld.sshfl [vmem:[%s1257_s0] sm:$0x33 pattern:$0x75316420]  ;;  %v908_v58 = vld [vmem:[%s1258_s1 + $0xb4] ss:$8 sps:$4 sm:$0xff]  }
  0x12   :  { %v106_v57 = vcombine.high %v729_v55, %v729_v55  ;;  %v910_v59 = vld [vmem:[%s1258_s1 + $0x1b4] ss:$8 sps:$4 sm:$0xff]   ;;  %v912_v61 = vld [vmem:[%s1258_s1 + $0xb0] ss:$8 sps:$4 sm:$0xff]   ;;  %v914_v0 = vld [vmem:[%s1258_s1 + $0xa4] ss:$8 sps:$4 sm:$0xff]  }
  0x13   :  { %461 = vmatpush1.bf16.msra.mxu0 %v865_v18  ;;  %v913_v62 = vld [vmem:[%s1258_s1 + $0x1b0] ss:$8 sps:$4 sm:$0xff]   ;;  %v916_v1 = vld [vmem:[%s1258_s1 + $0x1a4] ss:$8 sps:$4 sm:$0xff]   ;;  %v918_v2 = vld [vmem:[%s1258_s1 + $0xa0] ss:$8 sps:$4 sm:$0xff]  }
  0x14   :  { %502 = vmatpush1.bf16.msra.mxu1 %v866_v19  ;;  %462 = vmatprep.subr.bf16.mxu0 %v867_v20  ;;  %v120_v60 = vrot.slane %v106_v57, %v112_v53  ;;  %v919_v3 = vld [vmem:[%s1258_s1 + $0x1a0] ss:$8 sps:$4 sm:$0xff]   ;;  %v920_v4 = vld [vmem:[%s1258_s1 + $0x94] ss:$8 sps:$4 sm:$0xff]   ;;  %v924_v6 = vld [vmem:[%s1258_s1 + $0x90] ss:$8 sps:$4 sm:$0xff]  }
  0x15   :  { %503 = vmatprep.subr.bf16.mxu1 %v869_v21  ;;  %v922_v5 = vld [vmem:[%s1258_s1 + $0x194] ss:$8 sps:$4 sm:$0xff]   ;;  %v925_v7 = vld [vmem:[%s1258_s1 + $0x190] ss:$8 sps:$4 sm:$0xff]  }
  0x16   :  { %484 = vmatprep.mubr.bf16.mxu0 %v120_v60  ;;  %v122_v63 = vcombine.high %v120_v60, %v120_v60 }
  0x17   :  { %463 = vmatpush1.bf16.msra.mxu0 %v871_v22 }
  0x18   :  { %504 = vmatpush1.bf16.msra.mxu1 %v872_v23  ;;  %464 = vmatprep.subr.bf16.mxu0 %v873_v24 }
  0x19   :  { %505 = vmatprep.subr.bf16.mxu1 %v875_v25  ;;  %795 = vmatprep.mubr.msk.bf16.mxu1 %vm441_vm1, %v122_v63 }
  0x1b   :  { %465 = vmatpush1.bf16.msra.mxu0 %v877_v26 }
  0x1c   :  { %506 = vmatpush1.bf16.msra.mxu1 %v878_v27  ;;  %466 = vmatprep.subr.bf16.mxu0 %v879_v28 }
  0x1d   :  { %507 = vmatprep.subr.bf16.mxu1 %v881_v29 }
  0x1f   :  { %467 = vmatpush1.bf16.msra.mxu0 %v883_v31 }
  0x20   :  { %508 = vmatpush1.bf16.msra.mxu1 %v884_v32  ;;  %468 = vmatprep.subr.bf16.mxu0 %v885_v33 }
  0x21   :  { %794 = vmatprep.subr.msk.bf16.mxu1 %vm445_vm0, %v793_v34 }
  0x23   :  { %469 = vmatpush2.bf16.msra.mxu0 %v888_v36 }
  0x24   :  { %510 = vmatpush2.bf16.msra.mxu1 %v447_v37  ;;  %470 = vmatprep.subr.bf16.mxu0 %v890_v38 }
  0x25   :  { %511 = vmatprep.subr.bf16.mxu1 %v892_v39 }
  0x27   :  { %471 = vmatpush2.bf16.msra.mxu0 %v894_v43 }
  0x28   :  { %512 = vmatpush2.bf16.msra.mxu1 %v895_v44  ;;  %472 = vmatprep.subr.bf16.mxu0 %v896_v45 }
  0x29   :  { %513 = vmatprep.subr.bf16.mxu1 %v898_v46 }
  0x2b   :  { %473 = vmatpush2.bf16.msra.mxu0 %v900_v49 }
  0x2c   :  { %514 = vmatpush2.bf16.msra.mxu1 %v901_v50  ;;  %474 = vmatprep.subr.bf16.mxu0 %v902_v51 }
  0x2d   :  { %515 = vmatprep.subr.bf16.mxu1 %v904_v52 }
  0x2f   :  { %475 = vmatpush2.bf16.msra.mxu0 %v906_v54 }
  0x30   :  { %516 = vmatpush2.bf16.msra.mxu1 %v907_v56  ;;  %476 = vmatprep.subr.bf16.mxu0 %v908_v58 }
  0x31   :  { %517 = vmatprep.subr.bf16.mxu1 %v910_v59 }
  0x33   :  { %477 = vmatpush2.bf16.msra.mxu0 %v912_v61 }
  0x34   :  { %518 = vmatpush2.bf16.msra.mxu1 %v913_v62  ;;  %478 = vmatprep.subr.bf16.mxu0 %v914_v0 }
  0x35   :  { %519 = vmatprep.subr.bf16.mxu1 %v916_v1 }
  0x37   :  { %479 = vmatpush2.bf16.msra.mxu0 %v918_v2 }
  0x38   :  { %520 = vmatpush2.bf16.msra.mxu1 %v919_v3 }
  0x39   :  { %10 = vsyncpa [#allocation3], 0  ;;  %480 = vmatprep.subr.bf16.mxu0 %v920_v4  ;;  %521 = vmatprep.subr.bf16.mxu1 %v922_v5  ;;  %v926_v8 = vld [vmem:[%s1258_s1 + $0x84] ss:$8 sps:$4 sm:$0xff]   ;;  %v113_v10 = vrot.slane %v729_v55, %v112_v53  ;;  %v930_v11 = vld [vmem:[%s1258_s1 + $0x80] ss:$8 sps:$4 sm:$0xff]  }
  0x3a   :  { %v928_v9 = vld [vmem:[%s1258_s1 + $0x184] ss:$8 sps:$4 sm:$0xff]   ;;  %v931_v12 = vld [vmem:[%s1258_s1 + $0x180] ss:$8 sps:$4 sm:$0xff]   ;;  %v932_v13 = vld [vmem:[%s1260_s3 + $0x78] sm:$0xff]   ;;  %v90_v30 = vsub.s32 0, %v1125_v47 }
  0x3b   :  { %481 = vmatpush2.bf16.msra.mxu0 %v924_v6  ;;  %v121_v14 = vcombine.high %v113_v10, %v113_v10  ;;  %v933_v15 = vld [vmem:[%s1260_s3 + $0x38] sm:$0xff]   ;;  %v934_v16 = vld [vmem:[%s1260_s3 + $0x70] sm:$0xff]   ;;  %v936_v18 = vld [vmem:[%s1260_s3 + $0x68] sm:$0xff]   ;;  %v94_v32 = vsub.s32 1, %v1125_v47  ;;  %s971_s25 = smov [#allocation2]   ;;  %vm713_vm2 = vcmask 74752  }
  0x3c   :  { %522 = vmatpush2.bf16.msra.mxu1 %v925_v7  ;;  %482 = vmatprep.subr.bf16.mxu0 %v926_v8  ;;  %v935_v17 = vld [vmem:[%s1260_s3 + $0x30] sm:$0xff]   ;;  %v937_v19 = vld [vmem:[%s1260_s3 + $0x28] sm:$0xff]   ;;  %v938_v20 = vld [vmem:[%s1260_s3 + $0x60] sm:$0xff]   ;;  %s721_s26 = sshll.u32 %s971_s25, 4  ;;  %s722_s26 = int_to_ptr.vmem [resolvable:$true] %s721_s26 }
  0x3d   :  { %523 = vmatprep.subr.bf16.mxu1 %v928_v9  ;;  %v939_v21 = vld [vmem:[%s1260_s3 + $0x20] sm:$0xff]   ;;  %v940_v22 = vld [vmem:[%s1260_s3 + $0x58] sm:$0xff]   ;;  %v942_v24 = vld [vmem:[%s1260_s3 + $0x50] sm:$0xff]   ;;  %s948_s27 = scalar_lea.vmem %s722_s26, 32  ;;  %p953_p1 = scmp.lt.s32.totalorder %s722_s26, %s722_s26 }
  0x3e   :  { %v941_v23 = vld [vmem:[%s1260_s3 + $0x18] sm:$0xff]   ;;  %v943_v25 = vld [vmem:[%s1260_s3 + $0x10] sm:$0xff]   ;;  %v944_v26 = vld [vmem:[%s1260_s3 + $0x48] sm:$0xff]   ;;  %p949_p0 = scmp.ne.s32.totalorder %s722_s26, %s948_s27  ;;  %p954_p2 = scmp.lt.s32.totalorder %s948_s27, %s948_s27 }
  0x3f   :  { %483 = vmatpush2.bf16.msra.mxu0 %v930_v11  ;;  %v945_v27 = vld [vmem:[%s1260_s3 + $0x8] sm:$0xff]   ;;  %v946_v28 = vld [vmem:[%s1260_s3 + $0x40] sm:$0xff]  }
  0x40   :  { %524 = vmatpush2.bf16.msra.mxu1 %v931_v12  ;;  %813 = vmatprep.subr.bf16.mxu0 %v932_v13  ;;  %v947_v29 = vld [vmem:[%s1260_s3] sm:$0xff]   ;;  %p955_p3 = por %p954_p2, %p953_p1 }
  0x41   :  { %v86_v31 = vld [vmem:[%s1259_s2] sm:$0x3] }
  0x42   :  { %485 = vmatmul.mubr.bf16.vlgmr.msra.gmra.mxu0 %v113_v10  ;;  %v91_v33 = vrot.slane %v86_v31, %v90_v30  ;;  %v95_v34 = vrot.slane %v86_v31, %v94_v32  ;;  %v796_v52 = vld [vmem:[%s1261_s4] ss:$0 sm:$0xff]  ;;  %p956_p4 = pnand %p955_p3, %p949_p0 }
  0x43   :  { %526 = vmatmul.mubr.bf16.vlgmr.msra.gmra.mxu1 %v121_v14  ;;  %814 = vmatpush3.bf16.msra.mxu0 %v933_v15 }
  0x44   :  { %815 = vmatprep.subr.bf16.mxu0 %v934_v16 }
  0x47   :  { %816 = vmatpush3.bf16.msra.mxu0 %v935_v17 }
  0x48   :  { %817 = vmatprep.subr.bf16.mxu0 %v936_v18 }
  0x4b   :  { %818 = vmatpush3.bf16.msra.mxu0 %v937_v19 }
  0x4c   :  { %819 = vmatprep.subr.bf16.mxu0 %v938_v20 }
  0x4f   :  { %820 = vmatpush3.bf16.msra.mxu0 %v939_v21 }
  0x50   :  { %821 = vmatprep.subr.bf16.mxu0 %v940_v22 }
  0x53   :  { %822 = vmatpush3.bf16.msra.mxu0 %v941_v23 }
  0x54   :  { %823 = vmatprep.subr.bf16.mxu0 %v942_v24 }
  0x57   :  { %824 = vmatpush3.bf16.msra.mxu0 %v943_v25 }
  0x58   :  { %825 = vmatprep.subr.bf16.mxu0 %v944_v26 }
  0x5b   :  { %826 = vmatpush3.bf16.msra.mxu0 %v945_v27 }
  0x5c   :  { %827 = vmatprep.subr.bf16.mxu0 %v946_v28 }
  0x5f   :  { %828 = vmatpush3.bf16.msra.mxu0 %v947_v29 }
 0x102   :  { %v486_v35 = vpop.f32.mrf.mxu0 }
 0x103   :  { %v527_v36 = vpop.f32.mrf.mxu1  ;;  %v487_v37 = vadd.f32 %v486_v35, %v91_v33 }
 0x104   :  { %v488_v38 = vpop.f32.mrf.mxu0 }
 0x105   :  { %v529_v39 = vpop.f32.mrf.mxu1  ;;  %v528_v40 = vadd.f32 %v527_v36, %v487_v37  ;;  %v489_v41 = vadd.f32 %v488_v38, %v95_v34 }
 0x106   :  { %v490_v42 = vpop.f32.mrf.mxu0 }
 0x107   :  { %v531_v43 = vpop.f32.mrf.mxu1  ;;  %v530_v44 = vadd.f32 %v529_v39, %v489_v41  ;;  %v534_v45 = vmax.f32 %v528_v40, 0.0 }
 0x108   :  { %v491_v46 = vpop.f32.mrf.mxu0 }
 0x109   :  { %v532_v48 = vpop.f32.mrf.mxu1  ;;  %v535_v49 = vmax.f32 %v530_v44, 0.0  ;;  %v536_v51 = vpack.c.bf16 %v534_v45, %v534_v45 }
 0x10b   :  { %v537_v50 = vpack.c.bf16 %v535_v49, %v535_v49 }
 0x10d   :  { %705 = vmatprep.mubr.bf16.mxu0 %v537_v50 }
 0x10e   :  { %706 = vmatmul.mubr.bf16.vlgmr.msra.gmra.mxu0 %v536_v51 }
 0x1ce   :  { %v829_v47 = vpop.f32.mrf.mxu0 }
 0x1d0   :  { %v830_v53 = vpop.f32.mrf.mxu0 }
 0x1d1   :  { %v831_v54 = vadd.f32 %v830_v53, %v829_v47 }
 0x1d2   :  { %v832_v55 = vpop.f32.mrf.mxu0 }
 0x1d3   :  { %v708_v56 = vadd.f32 %v831_v54, %v796_v52 }
 0x1d4   :  { %v833_v57 = vpop.f32.mrf.mxu0 }
 0x1d5   :  { %714 = vst.msk [vmem:[#allocation2] sm:$0x3] %vm713_vm2, %v708_v56 }
 0x1d6   :  { %959 = shalt.err (!%p956_p4)
}
 0x1d7   :  { %724 = dma.vmem_to_hbm [thread:$0]  %s722_s26, 32, %s1262_s5, [#allocation3]  }
 0x1d8   :  { %968 = dma.done.wait [#allocation3], 32  }
 0x1d9   :  { %969 = vsyncadd [#allocation3], 4294967264 }
 0x1da   :  { %728 = vsyncpa [#allocation3], 1 }

</bundles_post_ra>
